<compile_context>
chip_gen: v7x
topology: tpu7x:2x2x1
jax: 0.10.0
libtpu: 0.0.40
codegen_flags: <defaults>
</compile_context>

<pallas_src>
import functools

import jax
import jax.numpy as jnp
from jax.experimental import pallas as pl
from jax.experimental.pallas import tpu as pltpu


# ----------------------------------------------------------------------------
# Helpers
# ----------------------------------------------------------------------------
def _round_up(x, m):
    return (x + m - 1) // m * m


def _pad_rows(a, n):
    if a.shape[0] == n:
        return a
    return jnp.pad(a, ((0, n - a.shape[0]), (0, 0)))


def _pad_cols(a, n):
    if a.shape[1] == n:
        return a
    return jnp.pad(a, ((0, 0), (0, n - a.shape[1])))


def _pad_index(idx, e_pad, fill):
    idx = idx.astype(jnp.int32)
    if idx.shape[0] == e_pad:
        return idx
    return jnp.pad(idx, (0, e_pad - idx.shape[0]), constant_values=fill)


def _tpu_vmem_capacity():
    try:
        return int(pltpu.get_tpu_info().vmem_capacity_bytes)
    except Exception:
        return 64 << 20          # conservative (v7x-sized) fallback


def _vmem_limit(estimate_bytes):
    cap = _tpu_vmem_capacity()
    ceiling = (3 * cap) // 4     # ~48 MiB on v7x, ~96 MiB on v5e/v6e
    return int(min(ceiling, max(32 << 20, 2 * int(estimate_bytes))))


def _row_tile(n_pad):
    # Largest power-of-two row tile (<=4096) that divides n_pad.
    for cand in (4096, 2048, 1024, 512, 256, 128):
        if n_pad % cand == 0:
            return min(cand, n_pad)
    return n_pad


def _gcn_padding_and_tiles(n, h):
    """Node padding + (row, k) tile sizes for the adjacency aggregation."""
    if n <= 512:
        n_pad = _round_up(max(n, 8), 128)
        return n_pad, n_pad, n_pad                   # single tile
    # Padding granularity decoupled from tile size (A is O(N^2)).
    n_pad = _round_up(n, 512)
    tm = 512
    budget = _tpu_vmem_capacity() // 3                # share for A dbl-buffer + resident XWs
    resident = n_pad * h * 2                          # XWs bf16, single-buffered
    tk = 512
    for cand in (4096, 2048, 1024):
        if n_pad % cand == 0 and (2 * tm * cand * 2 + resident) <= budget:
            tk = cand
            break
    return n_pad, tm, tk


def _edge_padding_and_tile(e):
    if e <= 2048:
        e_pad = _round_up(max(e, 8), 128)
        return e_pad, e_pad
    e_pad = _round_up(e, 2048)
    return e_pad, 2048


# ----------------------------------------------------------------------------
# Pallas kernels
# ----------------------------------------------------------------------------
def _fused_small_kernel(a_ref, dinv_ref, x_ref,
                        w1_ref, b1_ref, w2_ref, b2_ref, w3_ref, b3_ref,
                        gsrc_ref, gdst_ref, attr_ref,
                        m1s_ref, m1d_ref, m1a_ref, mb1_ref,
                        m2_ref, mb2_ref, m3_ref, mb3_ref, o_ref):
    """Whole forward pass for small graphs; everything resident in VMEM."""
    a = a_ref[...]                 # (N, N) bf16 0/1 (+self loops)
    dinv = dinv_ref[...]           # (N, 1) f32

    def gcn(h, w_ref, b_ref, relu):
        xw = jnp.dot(h, w_ref[...], preferred_element_type=jnp.float32)
        xws = (dinv * xw).astype(jnp.bfloat16)
        agg = jnp.dot(a, xws, preferred_element_type=jnp.float32)
        out = dinv * agg + b_ref[...]
        return jnp.maximum(out, 0.0) if relu else out

    h = gcn(x_ref[...], w1_ref, b1_ref, True)
    h = gcn(h, w2_ref, b2_ref, True)
    h = gcn(h, w3_ref, b3_ref, False)

    # Exact row gathers via one-hot matmuls (padded edges -> all-zero rows).
    h_src = jnp.dot(gsrc_ref[...], h, preferred_element_type=jnp.float32)
    h_dst = jnp.dot(gdst_ref[...], h, preferred_element_type=jnp.float32)

    z1 = (jnp.dot(h_src, m1s_ref[...], preferred_element_type=jnp.float32)
          + jnp.dot(h_dst, m1d_ref[...], preferred_element_type=jnp.float32)
          + jnp.dot(attr_ref[...], m1a_ref[...], preferred_element_type=jnp.float32)
          + mb1_ref[...])
    z1 = jnp.maximum(z1, 0.0)
    z2 = jnp.dot(z1, m2_ref[...], preferred_element_type=jnp.float32) + mb2_ref[...]
    z2 = jnp.maximum(z2, 0.0)
    # (H -> 1) projection as a VPU/XLU reduction (no near-empty MXU pass).
    logit = jnp.sum(z2 * m3_ref[...], axis=-1, keepdims=True) + mb3_ref[...]
    o_ref[...] = jax.nn.sigmoid(logit).astype(o_ref.dtype)


def _xw_scale_kernel(x_ref, w_ref, dinv_ref, o_ref):
    # XWs = dinv * (X @ W), stored bf16 for the big aggregation matmul.
    xw = jnp.dot(x_ref[...], w_ref[...], preferred_element_type=jnp.float32)
    o_ref[...] = (dinv_ref[...] * xw).astype(o_ref.dtype)


def _gcn_agg_kernel(a_ref, xws_ref, dinv_ref, b_ref, o_ref, *, apply_relu):
    # out = dinv * (A01 @ XWs) + b (optionally ReLU), tiled over (rows, k).
    # Accumulates directly into the revisited f32 output block (no scratch).
    k = pl.program_id(1)

    @pl.when(k == 0)
    def _init():
        o_ref[...] = jnp.zeros_like(o_ref)

    tk = a_ref.shape[1]
    off = pl.multiple_of(k * tk, tk)
    o_ref[...] += jnp.dot(a_ref[...], xws_ref[pl.ds(off, tk), :],
                          preferred_element_type=jnp.float32)

    @pl.when(k == pl.num_programs(1) - 1)
    def _finalize():
        out = dinv_ref[...] * o_ref[...] + b_ref[...]      # f32 elementwise
        if apply_relu:
            out = jnp.maximum(out, 0.0)
        o_ref[...] = out.astype(o_ref.dtype)


def _edge_mlp_kernel(hs_ref, hd_ref, ea_ref, w1s_ref, w1d_ref, w1a_ref, b1_ref,
                     w2_ref, b2_ref, w3_ref, b3_ref, o_ref):
    # Feature-major MLP: activations are (feat, edge_tile) bf16, so the lane
    # axis is the 128-multiple edge axis — lane-dense loads/stores throughout.
    z1 = (jnp.dot(w1s_ref[...], hs_ref[...], preferred_element_type=jnp.float32)
          + jnp.dot(w1d_ref[...], hd_ref[...], preferred_element_type=jnp.float32)
          + jnp.dot(w1a_ref[...], ea_ref[...], preferred_element_type=jnp.float32)
          + b1_ref[...])
    h1 = jnp.maximum(z1, 0.0)
    z2 = jnp.dot(w2_ref[...], h1, preferred_element_type=jnp.float32) + b2_ref[...]
    h2 = jnp.maximum(z2, 0.0)
    logit = jnp.sum(h2 * w3_ref[...], axis=0, keepdims=True) + b3_ref[...]
    o_ref[...] = jax.nn.sigmoid(logit).astype(o_ref.dtype)


# ----------------------------------------------------------------------------
# Pallas wrappers
# ----------------------------------------------------------------------------
def gcn_layer(a01_bf16, dinv_col, x_pad, w, b, *, apply_relu, tm, tk):
    n_pad, f = x_pad.shape
    h = w.shape[1]

    # 1) XWs = dinv * (X @ W) -> bf16, one large row tile per grid step.
    tr = _row_tile(n_pad)
    xws = pl.pallas_call(
        _xw_scale_kernel,
        out_shape=jax.ShapeDtypeStruct((n_pad, h), jnp.bfloat16),
        grid=(n_pad // tr,),
        in_specs=[
            pl.BlockSpec((tr, f), lambda i: (i, 0)),
            pl.BlockSpec((f, h), lambda i: (0, 0)),
            pl.BlockSpec((tr, 1), lambda i: (i, 0)),
        ],
        out_specs=pl.BlockSpec((tr, h), lambda i: (i, 0)),
        compiler_params=pltpu.CompilerParams(
            dimension_semantics=("parallel",),
            vmem_limit_bytes=_vmem_limit(2 * tr * (f + h) * 4)),
        cost_estimate=pl.CostEstimate(
            flops=2 * n_pad * f * h,
            transcendentals=0,
            bytes_accessed=n_pad * f * 4 + f * h * 4 + n_pad * h * 2),
    )(x_pad, w, dinv_col)

    # 2) out = dinv * (A01 @ XWs) + b, tiled (row, k) with resident XWs.
    kern = functools.partial(_gcn_agg_kernel, apply_relu=apply_relu)
    vmem_est = (2 * tm * tk * 2          # A tiles, double-buffered, bf16
                + n_pad * h * 2          # resident XWs (bf16, Buffered(1))
                + 2 * tm * h * 4         # output (accumulator) tiles
                + 2 * tm * 4 + 2 * h * 4)
    out = pl.pallas_call(
        kern,
        out_shape=jax.ShapeDtypeStruct((n_pad, h), jnp.float32),
        grid=(n_pad // tm, n_pad // tk),
        in_specs=[
            pl.BlockSpec((tm, tk), lambda i, k: (i, k)),     # A01 tile (bf16)
            pl.BlockSpec((n_pad, h), lambda i, k: (0, 0),    # XWs resident,
                         pipeline_mode=pl.Buffered(1)),      # single-buffered
            pl.BlockSpec((tm, 1), lambda i, k: (i, 0)),      # dinv rows
            pl.BlockSpec((1, h), lambda i, k: (0, 0)),       # bias
        ],
        out_specs=pl.BlockSpec((tm, h), lambda i, k: (i, 0)),
        compiler_params=pltpu.CompilerParams(
            dimension_semantics=("parallel", "arbitrary"),
            vmem_limit_bytes=_vmem_limit(vmem_est)),
        cost_estimate=pl.CostEstimate(
            flops=2 * n_pad * n_pad * h,
            transcendentals=0,
            bytes_accessed=n_pad * n_pad * 2 + n_pad * h * 2 + n_pad * h * 4),
    )(a01_bf16, xws, dinv_col, b.reshape(1, h))
    return out


def edge_mlp(h_srcT, h_dstT, attrT, params, *, te):
    h_dim = h_srcT.shape[0]
    f_e = attrT.shape[0]
    e_pad = h_srcT.shape[1]

    w1 = params["mlp_w1"]                      # (2H + F_e, H)
    w1sT = w1[:h_dim].T                        # (H, H)
    w1dT = w1[h_dim:2 * h_dim].T               # (H, H)
    w1aT = w1[2 * h_dim:].T                    # (H, F_e)
    w2T = params["mlp_w2"].T                   # (H, H)
    b1 = params["mlp_b1"].reshape(h_dim, 1)
    b2 = params["mlp_b2"].reshape(h_dim, 1)
    w3 = params["mlp_w3"].reshape(h_dim, 1)
    b3 = params["mlp_b3"].reshape(1, 1)

    flops = e_pad * (2 * h_dim * (2 * h_dim + f_e) + 2 * h_dim * h_dim + 2 * h_dim)
    vmem_est = 2 * te * (2 * h_dim + f_e) * 2 + 2 * te * 4
    out = pl.pallas_call(
        _edge_mlp_kernel,
        out_shape=jax.ShapeDtypeStruct((1, e_pad), jnp.float32),
        grid=(e_pad // te,),
        in_specs=[
            pl.BlockSpec((h_dim, te), lambda e: (0, e)),   # h[src]^T (bf16)
            pl.BlockSpec((h_dim, te), lambda e: (0, e)),   # h[dst]^T (bf16)
            pl.BlockSpec((f_e, te), lambda e: (0, e)),     # edge_attr^T (bf16)
            pl.BlockSpec((h_dim, h_dim), lambda e: (0, 0)),
            pl.BlockSpec((h_dim, h_dim), lambda e: (0, 0)),
            pl.BlockSpec((h_dim, f_e), lambda e: (0, 0)),
            pl.BlockSpec((h_dim, 1), lambda e: (0, 0)),
            pl.BlockSpec((h_dim, h_dim), lambda e: (0, 0)),
            pl.BlockSpec((h_dim, 1), lambda e: (0, 0)),
            pl.BlockSpec((h_dim, 1), lambda e: (0, 0)),
            pl.BlockSpec((1, 1), lambda e: (0, 0)),
        ],
        out_specs=pl.BlockSpec((1, te), lambda e: (0, e)),
        compiler_params=pltpu.CompilerParams(
            dimension_semantics=("parallel",),
            vmem_limit_bytes=_vmem_limit(vmem_est)),
        cost_estimate=pl.CostEstimate(
            flops=flops,
            transcendentals=e_pad,
            bytes_accessed=e_pad * (2 * h_dim + f_e) * 2 + e_pad * 4),
    )(h_srcT, h_dstT, attrT, w1sT, w1dT, w1aT, b1, w2T, b2, w3, b3)
    return out


# ----------------------------------------------------------------------------
# Glue: un-normalized 0/1 adjacency (+ self loops) and dinv vector.
# Matches PyG GCNConv defaults (add_self_loops=True, symmetric norm).
# Duplicate edges accumulate entries > 1 (same as the dense reference).
# ----------------------------------------------------------------------------
# TODO(synk): the sparse edge scatter into the dense adjacency and the degree
# segment-sum remain XLA glue (data-dependent scatter); a per-edge in-kernel
# DMA scatter would serialize the grid per edge and is not worthwhile here.
def build_adjacency(edge_index, num_nodes, n_pad):
    src, dst = edge_index[0], edge_index[1]
    a = jnp.zeros((n_pad, n_pad), jnp.bfloat16)
    a = a.at[dst, src].add(jnp.ones(src.shape, jnp.bfloat16))   # edge s->t at a[t,s]
    idx = jnp.arange(num_nodes)
    a = a.at[idx, idx].add(jnp.ones((num_nodes,), jnp.bfloat16))  # self loops
    deg = jnp.zeros((n_pad,), jnp.float32)
    deg = deg.at[dst].add(1.0)
    deg = deg.at[idx].add(1.0)
    dinv = jnp.where(deg > 0, 1.0 / jnp.sqrt(deg), 0.0)
    return a, dinv.reshape(n_pad, 1)


# ----------------------------------------------------------------------------
# Model
# ----------------------------------------------------------------------------
def init_params(key, node_feat_dim, edge_feat_dim, hidden_dim):
    ks = jax.random.split(key, 12)

    def glorot(k, fan_in, fan_out):
        lim = jnp.sqrt(6.0 / (fan_in + fan_out))
        return jax.random.uniform(k, (fan_in, fan_out), jnp.float32, -lim, lim)

    mlp_in = 2 * hidden_dim + edge_feat_dim
    return dict(
        conv1_w=glorot(ks[0], node_feat_dim, hidden_dim),
        conv1_b=jnp.zeros((hidden_dim,), jnp.float32),
        conv2_w=glorot(ks[1], hidden_dim, hidden_dim),
        conv2_b=jnp.zeros((hidden_dim,), jnp.float32),
        conv3_w=glorot(ks[2], hidden_dim, hidden_dim),
        conv3_b=jnp.zeros((hidden_dim,), jnp.float32),
        mlp_w1=glorot(ks[3], mlp_in, hidden_dim),
        mlp_b1=jax.random.uniform(ks[4], (hidden_dim,), jnp.float32, -0.1, 0.1),
        mlp_w2=glorot(ks[5], hidden_dim, hidden_dim),
        mlp_b2=jax.random.uniform(ks[6], (hidden_dim,), jnp.float32, -0.1, 0.1),
        mlp_w3=glorot(ks[7], hidden_dim, 1),
        mlp_b3=jax.random.uniform(ks[8], (1,), jnp.float32, -0.1, 0.1),
    )


def _forward_fused_small(params, x, edge_index, edge_attr):
    """One fully-fused pallas_call: 3 GCN layers + gathers + edge MLP."""
    num_nodes, f_node = x.shape
    num_edges, f_edge = edge_attr.shape
    hidden = params["conv1_w"].shape[1]

    n_pad = _round_up(max(num_nodes, 8), 128)
    e_pad = _round_up(max(num_edges, 8), 128)

    a01, dinv = build_adjacency(edge_index, num_nodes, n_pad)
    x_pad = _pad_rows(x, n_pad)

    src, dst = edge_index[0], edge_index[1]
    # One-hot gather matrices; padded edges point at an out-of-range class,
    # producing all-zero rows (exact gather on the MXU, no XLA gather glue).
    src_p = _pad_index(src, e_pad, n_pad)
    dst_p = _pad_index(dst, e_pad, n_pad)
    gsrc = jax.nn.one_hot(src_p, n_pad, dtype=jnp.bfloat16)     # (E_pad, N_pad)
    gdst = jax.nn.one_hot(dst_p, n_pad, dtype=jnp.bfloat16)
    attr_pad = _pad_rows(edge_attr, e_pad)                       # (E_pad, F_e) f32

    w1 = params["mlp_w1"]
    vmem_est = (n_pad * n_pad * 2 + 2 * e_pad * n_pad * 2
                + n_pad * (f_node + 4 * hidden) * 4
                + e_pad * (f_edge + 6 * hidden) * 4)
    flops = (2 * n_pad * hidden * (f_node + 2 * hidden + 3 * n_pad)
             + 2 * e_pad * (2 * n_pad * hidden + hidden * (2 * hidden + f_edge)
                            + hidden * hidden + hidden))

    out = pl.pallas_call(
        _fused_small_kernel,
        out_shape=jax.ShapeDtypeStruct((e_pad, 1), jnp.float32),
        compiler_params=pltpu.CompilerParams(
            vmem_limit_bytes=_vmem_limit(vmem_est)),
        cost_estimate=pl.CostEstimate(
            flops=flops, transcendentals=e_pad, bytes_accessed=vmem_est),
    )(a01, dinv, x_pad,
      params["conv1_w"], params["conv1_b"].reshape(1, hidden),
      params["conv2_w"], params["conv2_b"].reshape(1, hidden),
      params["conv3_w"], params["conv3_b"].reshape(1, hidden),
      gsrc, gdst, attr_pad,
      w1[:hidden], w1[hidden:2 * hidden], w1[2 * hidden:],
      params["mlp_b1"].reshape(1, hidden),
      params["mlp_w2"], params["mlp_b2"].reshape(1, hidden),
      params["mlp_w3"].reshape(1, hidden), params["mlp_b3"].reshape(1, 1))
    return out[:num_edges, 0]


def _forward_tiled(params, x, edge_index, edge_attr):
    """Large-graph path: tiled GCN aggregation + feature-major edge MLP."""
    num_nodes = x.shape[0]
    num_edges = edge_attr.shape[0]
    hidden = params["conv1_w"].shape[1]
    n_pad, tm, tk = _gcn_padding_and_tiles(num_nodes, hidden)

    a01, dinv = build_adjacency(edge_index, num_nodes, n_pad)
    x_pad = _pad_rows(x, n_pad)

    h = gcn_layer(a01, dinv, x_pad, params["conv1_w"], params["conv1_b"],
                  apply_relu=True, tm=tm, tk=tk)
    h = gcn_layer(a01, dinv, h, params["conv2_w"], params["conv2_b"],
                  apply_relu=True, tm=tm, tk=tk)
    h = gcn_layer(a01, dinv, h, params["conv3_w"], params["conv3_b"],
                  apply_relu=False, tm=tm, tk=tk)

    src, dst = edge_index[0], edge_index[1]
    e_pad, te = _edge_padding_and_tile(num_edges)
    # Feature-major (lane-dense), bf16 edge operands; padded edges = zero cols.
    h_srcT = _pad_cols(h[src].astype(jnp.bfloat16).T, e_pad)     # (H, E_pad)
    h_dstT = _pad_cols(h[dst].astype(jnp.bfloat16).T, e_pad)     # (H, E_pad)
    attrT = _pad_cols(edge_attr.astype(jnp.bfloat16).T, e_pad)   # (F_e, E_pad)

    probs = edge_mlp(h_srcT, h_dstT, attrT, params, te=te)       # (1, E_pad)
    return probs[0, :num_edges]


def edge_classifier_forward(params, x, edge_index, edge_attr):
    num_nodes = x.shape[0]
    num_edges = edge_attr.shape[0]
    if num_nodes <= 512 and num_edges <= 2048:
        return _forward_fused_small(params, x, edge_index, edge_attr)
    return _forward_tiled(params, x, edge_index, edge_attr)


# Pure-JAX reference.  match_kernel_dtypes=True mirrors the kernel numerics
# (bf16 A / XWs with f32 accumulation); edge_inputs_bf16=True additionally
# mirrors the large-graph path's bf16 edge-MLP activation stream.
def reference_forward(params, x, edge_index, edge_attr, *,
                      match_kernel_dtypes, edge_inputs_bf16=False):
    num_nodes = x.shape[0]
    src, dst = edge_index[0], edge_index[1]
    a = jnp.zeros((num_nodes, num_nodes), jnp.float32)
    a = a.at[dst, src].add(1.0)
    a = a + jnp.eye(num_nodes, dtype=jnp.float32)
    deg = jnp.sum(a, axis=1)
    dinv = jnp.where(deg > 0, 1.0 / jnp.sqrt(deg), 0.0)

    def layer(hcur, w, b, relu):
        xws = dinv[:, None] * (hcur @ w)
        a_op = a
        if match_kernel_dtypes:
            xws = xws.astype(jnp.bfloat16)
            a_op = a.astype(jnp.bfloat16)
        agg = jnp.dot(a_op, xws, preferred_element_type=jnp.float32)
        out = dinv[:, None] * agg + b
        return jnp.maximum(out, 0.0) if relu else out

    h = layer(x, params["conv1_w"], params["conv1_b"], True)
    h = layer(h, params["conv2_w"], params["conv2_b"], True)
    h = layer(h, params["conv3_w"], params["conv3_b"], False)

    hs, hd, ea = h[src], h[dst], edge_attr
    if match_kernel_dtypes and edge_inputs_bf16:
        hs = hs.astype(jnp.bfloat16).astype(jnp.float32)
        hd = hd.astype(jnp.bfloat16).astype(jnp.float32)
        ea = ea.astype(jnp.bfloat16).astype(jnp.float32)
    e = jnp.concatenate([hs, hd, ea], axis=1)
    e = jax.nn.relu(e @ params["mlp_w1"] + params["mlp_b1"])
    e = jax.nn.relu(e @ params["mlp_w2"] + params["mlp_b2"])
    return jax.nn.sigmoid(e @ params["mlp_w3"] + params["mlp_b3"])[:, 0]


# ----------------------------------------------------------------------------
if __name__ == "__main__":
    NODE_FEAT = 5      # [x, y, z, cell_count/10, cell_value]
    EDGE_FEAT = 5      # [dpos(3), distance, |dE|]
    HIDDEN = 32
    N_NODES = 16
    N_EDGES = 8

    key = jax.random.PRNGKey(0)
    k_pos, k_cells, k_val, k_src, k_dst, k_par = jax.random.split(key, 6)

    xyz = jax.random.normal(k_pos, (N_NODES, 3), jnp.float32)
    hit_cells = jax.random.randint(k_cells, (N_NODES, 1), 1, 10).astype(jnp.float32) / 10.0
    hit_value = jax.random.uniform(k_val, (N_NODES, 1), jnp.float32)
    node_features = jnp.concatenate([xyz, hit_cells, hit_value], axis=1)

    src = jax.random.randint(k_src, (N_EDGES,), 0, N_NODES)
    dst = jax.random.randint(k_dst, (N_EDGES,), 0, N_NODES)
    edge_index = jnp.stack([src, dst], axis=0)

    delta_energy = jnp.abs(node_features[src, 3] - node_features[dst, 3])[:, None]
    delta_pos = node_features[dst, :3] - node_features[src, :3]
    distance = jnp.linalg.norm(delta_pos, axis=1, keepdims=True)
    edge_attr = jnp.concatenate([delta_pos, distance, delta_energy], axis=1)

    params = init_params(k_par, NODE_FEAT, EDGE_FEAT, HIDDEN)

    fwd = jax.jit(edge_classifier_forward)
    out = fwd(params, node_features, edge_index, edge_attr)
    out = jax.block_until_ready(out)
    assert out.shape == (N_EDGES,)

    # Tight check vs. a reference that mirrors the kernel numerics
    # (small-graph fused path: bf16 A / XWs, f32 elsewhere).
    ref_matched = reference_forward(params, node_features, edge_index, edge_attr,
                                    match_kernel_dtypes=True, edge_inputs_bf16=False)
    assert jnp.allclose(out, ref_matched, atol=1e-3, rtol=1e-3), (out, ref_matched)

    # Loose sanity check vs. the original full-f32 semantics.
    ref_f32 = reference_forward(params, node_features, edge_index, edge_attr,
                                match_kernel_dtypes=False)
    assert jnp.allclose(out, ref_f32, atol=5e-2, rtol=5e-2), (out, ref_f32)

    print("KERNEL_OK")
</pallas_src>

<mosaic_0001>
module attributes {stable_mosaic.version = 11 : i64} {
  func.func private @main(%arg0: i32) attributes {dimension_semantics = [#tpu.dimension_semantics<core_parallel>], iteration_bounds = array<i64: 2>, tpu.core_type = #tpu.core_type<sc_scalar_subcore>, window_params = []} {
    return
  }
}

module attributes {stable_mosaic.version = 11 : i64} {
  func.func private @main(%arg0: i32) attributes {dimension_semantics = [#tpu.dimension_semantics<core_parallel>], iteration_bounds = array<i64: 2>, tpu.core_type = #tpu.core_type<sc_scalar_subcore>, window_params = []} {
    return
  }
}

module attributes {stable_mosaic.version = 11 : i64} {
  func.func @_fused_small_kernel(%arg0: memref<128x128xbf16, #tpu.memory_space<vmem>>, %arg1: memref<128x1xf32, #tpu.memory_space<vmem>>, %arg2: memref<128x5xf32, #tpu.memory_space<vmem>>, %arg3: memref<5x32xf32, #tpu.memory_space<vmem>>, %arg4: memref<1x32xf32, #tpu.memory_space<vmem>>, %arg5: memref<32x32xf32, #tpu.memory_space<vmem>>, %arg6: memref<1x32xf32, #tpu.memory_space<vmem>>, %arg7: memref<32x32xf32, #tpu.memory_space<vmem>>, %arg8: memref<1x32xf32, #tpu.memory_space<vmem>>, %arg9: memref<128x128xbf16, #tpu.memory_space<vmem>>, %arg10: memref<128x128xbf16, #tpu.memory_space<vmem>>, %arg11: memref<128x5xf32, #tpu.memory_space<vmem>>, %arg12: memref<32x32xf32, #tpu.memory_space<vmem>>, %arg13: memref<32x32xf32, #tpu.memory_space<vmem>>, %arg14: memref<5x32xf32, #tpu.memory_space<vmem>>, %arg15: memref<1x32xf32, #tpu.memory_space<vmem>>, %arg16: memref<32x32xf32, #tpu.memory_space<vmem>>, %arg17: memref<1x32xf32, #tpu.memory_space<vmem>>, %arg18: memref<1x32xf32, #tpu.memory_space<vmem>>, %arg19: memref<1x1xf32, #tpu.memory_space<vmem>>, %arg20: memref<128x1xf32, #tpu.memory_space<vmem>>) attributes {dimension_semantics = [], scalar_prefetch = 0 : i64, scratch_operands = 0 : i64, tpu.core_type = #tpu.core_type<tc>} {
    %c0 = arith.constant 0 : index
    %c0_0 = arith.constant 0 : index
    %0 = vector.load %arg0[%c0, %c0_0] : memref<128x128xbf16, #tpu.memory_space<vmem>>, vector<128x128xbf16>
    %c0_1 = arith.constant 0 : index
    %c0_2 = arith.constant 0 : index
    %1 = vector.load %arg1[%c0_1, %c0_2] : memref<128x1xf32, #tpu.memory_space<vmem>>, vector<128x1xf32>
    %c0_3 = arith.constant 0 : index
    %c0_4 = arith.constant 0 : index
    %2 = vector.load %arg2[%c0_3, %c0_4] : memref<128x5xf32, #tpu.memory_space<vmem>>, vector<128x5xf32>
    %c0_5 = arith.constant 0 : index
    %c0_6 = arith.constant 0 : index
    %3 = vector.load %arg3[%c0_5, %c0_6] : memref<5x32xf32, #tpu.memory_space<vmem>>, vector<5x32xf32>
    %cst = arith.constant dense<0.000000e+00> : vector<128x32xf32>
    %4 = tpu.matmul %2, %3, %cst {dimension_numbers = #tpu.dot_dimension_numbers<[1], [0], [0], [1], [0, 0, 1, 1], [], []>} : vector<128x5xf32>, vector<5x32xf32>, vector<128x32xf32> -> vector<128x32xf32>
    %5 = vector.broadcast %1 : vector<128x1xf32> to vector<128x32xf32>
    %6 = arith.mulf %5, %4 : vector<128x32xf32>
    %7 = arith.truncf %6 : vector<128x32xf32> to vector<128x32xbf16>
    %cst_7 = arith.constant dense<0.000000e+00> : vector<128x32xf32>
    %8 = tpu.matmul %0, %7, %cst_7 {dimension_numbers = #tpu.dot_dimension_numbers<[1], [0], [0], [1], [0, 0, 1, 1], [], []>} : vector<128x128xbf16>, vector<128x32xbf16>, vector<128x32xf32> -> vector<128x32xf32>
    %9 = vector.broadcast %1 : vector<128x1xf32> to vector<128x32xf32>
    %10 = arith.mulf %9, %8 : vector<128x32xf32>
    %c0_8 = arith.constant 0 : index
    %c0_9 = arith.constant 0 : index
    %11 = vector.load %arg4[%c0_8, %c0_9] : memref<1x32xf32, #tpu.memory_space<vmem>>, vector<1x32xf32>
    %12 = vector.broadcast %11 : vector<1x32xf32> to vector<128x32xf32>
    %13 = arith.addf %10, %12 : vector<128x32xf32>
    %cst_10 = arith.constant 0.000000e+00 : f32
    %14 = vector.broadcast %cst_10 : f32 to vector<128x32xf32>
    %15 = arith.maximumf %13, %14 : vector<128x32xf32>
    %c0_11 = arith.constant 0 : index
    %c0_12 = arith.constant 0 : index
    %16 = vector.load %arg5[%c0_11, %c0_12] : memref<32x32xf32, #tpu.memory_space<vmem>>, vector<32x32xf32>
    %cst_13 = arith.constant dense<0.000000e+00> : vector<128x32xf32>
    %17 = tpu.matmul %15, %16, %cst_13 {dimension_numbers = #tpu.dot_dimension_numbers<[1], [0], [0], [1], [0, 0, 1, 1], [], []>} : vector<128x32xf32>, vector<32x32xf32>, vector<128x32xf32> -> vector<128x32xf32>
    %18 = vector.broadcast %1 : vector<128x1xf32> to vector<128x32xf32>
    %19 = arith.mulf %18, %17 : vector<128x32xf32>
    %20 = arith.truncf %19 : vector<128x32xf32> to vector<128x32xbf16>
    %cst_14 = arith.constant dense<0.000000e+00> : vector<128x32xf32>
    %21 = tpu.matmul %0, %20, %cst_14 {dimension_numbers = #tpu.dot_dimension_numbers<[1], [0], [0], [1], [0, 0, 1, 1], [], []>} : vector<128x128xbf16>, vector<128x32xbf16>, vector<128x32xf32> -> vector<128x32xf32>
    %22 = vector.broadcast %1 : vector<128x1xf32> to vector<128x32xf32>
    %23 = arith.mulf %22, %21 : vector<128x32xf32>
    %c0_15 = arith.constant 0 : index
    %c0_16 = arith.constant 0 : index
    %24 = vector.load %arg6[%c0_15, %c0_16] : memref<1x32xf32, #tpu.memory_space<vmem>>, vector<1x32xf32>
    %25 = vector.broadcast %24 : vector<1x32xf32> to vector<128x32xf32>
    %26 = arith.addf %23, %25 : vector<128x32xf32>
    %cst_17 = arith.constant 0.000000e+00 : f32
    %27 = vector.broadcast %cst_17 : f32 to vector<128x32xf32>
    %28 = arith.maximumf %26, %27 : vector<128x32xf32>
    %c0_18 = arith.constant 0 : index
    %c0_19 = arith.constant 0 : index
    %29 = vector.load %arg7[%c0_18, %c0_19] : memref<32x32xf32, #tpu.memory_space<vmem>>, vector<32x32xf32>
    %cst_20 = arith.constant dense<0.000000e+00> : vector<128x32xf32>
    %30 = tpu.matmul %28, %29, %cst_20 {dimension_numbers = #tpu.dot_dimension_numbers<[1], [0], [0], [1], [0, 0, 1, 1], [], []>} : vector<128x32xf32>, vector<32x32xf32>, vector<128x32xf32> -> vector<128x32xf32>
    %31 = vector.broadcast %1 : vector<128x1xf32> to vector<128x32xf32>
    %32 = arith.mulf %31, %30 : vector<128x32xf32>
    %33 = arith.truncf %32 : vector<128x32xf32> to vector<128x32xbf16>
    %cst_21 = arith.constant dense<0.000000e+00> : vector<128x32xf32>
    %34 = tpu.matmul %0, %33, %cst_21 {dimension_numbers = #tpu.dot_dimension_numbers<[1], [0], [0], [1], [0, 0, 1, 1], [], []>} : vector<128x128xbf16>, vector<128x32xbf16>, vector<128x32xf32> -> vector<128x32xf32>
    %35 = vector.broadcast %1 : vector<128x1xf32> to vector<128x32xf32>
    %36 = arith.mulf %35, %34 : vector<128x32xf32>
    %c0_22 = arith.constant 0 : index
    %c0_23 = arith.constant 0 : index
    %37 = vector.load %arg8[%c0_22, %c0_23] : memref<1x32xf32, #tpu.memory_space<vmem>>, vector<1x32xf32>
    %38 = vector.broadcast %37 : vector<1x32xf32> to vector<128x32xf32>
    %39 = arith.addf %36, %38 : vector<128x32xf32>
    %c0_24 = arith.constant 0 : index
    %c0_25 = arith.constant 0 : index
    %40 = vector.load %arg9[%c0_24, %c0_25] : memref<128x128xbf16, #tpu.memory_space<vmem>>, vector<128x128xbf16>
    %cst_26 = arith.constant dense<0.000000e+00> : vector<128x32xf32>
    %41 = tpu.matmul %40, %39, %cst_26 {dimension_numbers = #tpu.dot_dimension_numbers<[1], [0], [0], [1], [0, 0, 1, 1], [], []>} : vector<128x128xbf16>, vector<128x32xf32>, vector<128x32xf32> -> vector<128x32xf32>
    %c0_27 = arith.constant 0 : index
    %c0_28 = arith.constant 0 : index
    %42 = vector.load %arg10[%c0_27, %c0_28] : memref<128x128xbf16, #tpu.memory_space<vmem>>, vector<128x128xbf16>
    %cst_29 = arith.constant dense<0.000000e+00> : vector<128x32xf32>
    %43 = tpu.matmul %42, %39, %cst_29 {dimension_numbers = #tpu.dot_dimension_numbers<[1], [0], [0], [1], [0, 0, 1, 1], [], []>} : vector<128x128xbf16>, vector<128x32xf32>, vector<128x32xf32> -> vector<128x32xf32>
    %c0_30 = arith.constant 0 : index
    %c0_31 = arith.constant 0 : index
    %44 = vector.load %arg12[%c0_30, %c0_31] : memref<32x32xf32, #tpu.memory_space<vmem>>, vector<32x32xf32>
    %cst_32 = arith.constant dense<0.000000e+00> : vector<128x32xf32>
    %45 = tpu.matmul %41, %44, %cst_32 {dimension_numbers = #tpu.dot_dimension_numbers<[1], [0], [0], [1], [0, 0, 1, 1], [], []>} : vector<128x32xf32>, vector<32x32xf32>, vector<128x32xf32> -> vector<128x32xf32>
    %c0_33 = arith.constant 0 : index
    %c0_34 = arith.constant 0 : index
    %46 = vector.load %arg13[%c0_33, %c0_34] : memref<32x32xf32, #tpu.memory_space<vmem>>, vector<32x32xf32>
    %cst_35 = arith.constant dense<0.000000e+00> : vector<128x32xf32>
    %47 = tpu.matmul %43, %46, %cst_35 {dimension_numbers = #tpu.dot_dimension_numbers<[1], [0], [0], [1], [0, 0, 1, 1], [], []>} : vector<128x32xf32>, vector<32x32xf32>, vector<128x32xf32> -> vector<128x32xf32>
    %48 = arith.addf %45, %47 : vector<128x32xf32>
    %c0_36 = arith.constant 0 : index
    %c0_37 = arith.constant 0 : index
    %49 = vector.load %arg11[%c0_36, %c0_37] : memref<128x5xf32, #tpu.memory_space<vmem>>, vector<128x5xf32>
    %c0_38 = arith.constant 0 : index
    %c0_39 = arith.constant 0 : index
    %50 = vector.load %arg14[%c0_38, %c0_39] : memref<5x32xf32, #tpu.memory_space<vmem>>, vector<5x32xf32>
    %cst_40 = arith.constant dense<0.000000e+00> : vector<128x32xf32>
    %51 = tpu.matmul %49, %50, %cst_40 {dimension_numbers = #tpu.dot_dimension_numbers<[1], [0], [0], [1], [0, 0, 1, 1], [], []>} : vector<128x5xf32>, vector<5x32xf32>, vector<128x32xf32> -> vector<128x32xf32>
    %52 = arith.addf %48, %51 : vector<128x32xf32>
    %c0_41 = arith.constant 0 : index
    %c0_42 = arith.constant 0 : index
    %53 = vector.load %arg15[%c0_41, %c0_42] : memref<1x32xf32, #tpu.memory_space<vmem>>, vector<1x32xf32>
    %54 = vector.broadcast %53 : vector<1x32xf32> to vector<128x32xf32>
    %55 = arith.addf %52, %54 : vector<128x32xf32>
    %cst_43 = arith.constant 0.000000e+00 : f32
    %56 = vector.broadcast %cst_43 : f32 to vector<128x32xf32>
    %57 = arith.maximumf %55, %56 : vector<128x32xf32>
    %c0_44 = arith.constant 0 : index
    %c0_45 = arith.constant 0 : index
    %58 = vector.load %arg16[%c0_44, %c0_45] : memref<32x32xf32, #tpu.memory_space<vmem>>, vector<32x32xf32>
    %cst_46 = arith.constant dense<0.000000e+00> : vector<128x32xf32>
    %59 = tpu.matmul %57, %58, %cst_46 {dimension_numbers = #tpu.dot_dimension_numbers<[1], [0], [0], [1], [0, 0, 1, 1], [], []>} : vector<128x32xf32>, vector<32x32xf32>, vector<128x32xf32> -> vector<128x32xf32>
    %c0_47 = arith.constant 0 : index
    %c0_48 = arith.constant 0 : index
    %60 = vector.load %arg17[%c0_47, %c0_48] : memref<1x32xf32, #tpu.memory_space<vmem>>, vector<1x32xf32>
    %61 = vector.broadcast %60 : vector<1x32xf32> to vector<128x32xf32>
    %62 = arith.addf %59, %61 : vector<128x32xf32>
    %cst_49 = arith.constant 0.000000e+00 : f32
    %63 = vector.broadcast %cst_49 : f32 to vector<128x32xf32>
    %64 = arith.maximumf %62, %63 : vector<128x32xf32>
    %c0_50 = arith.constant 0 : index
    %c0_51 = arith.constant 0 : index
    %65 = vector.load %arg18[%c0_50, %c0_51] : memref<1x32xf32, #tpu.memory_space<vmem>>, vector<1x32xf32>
    %66 = vector.broadcast %65 : vector<1x32xf32> to vector<128x32xf32>
    %67 = arith.mulf %64, %66 : vector<128x32xf32>
    %cst_52 = arith.constant dense<0.000000e+00> : vector<128xf32>
    %68 = vector.multi_reduction <add>, %67, %cst_52 [1] : vector<128x32xf32> to vector<128xf32>
    %69 = vector.shape_cast %68 : vector<128xf32> to vector<128x1xf32>
    %c0_53 = arith.constant 0 : index
    %c0_54 = arith.constant 0 : index
    %70 = vector.load %arg19[%c0_53, %c0_54] : memref<1x1xf32, #tpu.memory_space<vmem>>, vector<1x1xf32>
    %71 = vector.broadcast %70 : vector<1x1xf32> to vector<128x1xf32>
    %72 = arith.addf %69, %71 : vector<128x1xf32>
    %73 = arith.negf %72 : vector<128x1xf32>
    %74 = math.exp %73 : vector<128x1xf32>
    %cst_55 = arith.constant 1.000000e+00 : f32
    %75 = vector.broadcast %cst_55 : f32 to vector<128x1xf32>
    %76 = arith.addf %75, %74 : vector<128x1xf32>
    %77 = arith.divf %75, %76 : vector<128x1xf32>
    %c0_56 = arith.constant 0 : index
    %c0_57 = arith.constant 0 : index
    %78 = vector.load %arg20[%c0_56, %c0_57] : memref<128x1xf32, #tpu.memory_space<vmem>>, vector<128x1xf32>
    tpu.vector_store %arg20[%c0_56, %c0_57], %77 {strides = array<i32>} : memref<128x1xf32, #tpu.memory_space<vmem>>, vector<128x1xf32>,
    return
  }
}

</mosaic_0001>

<bundles_post_ra>
// kernel: edge_classifier_forward.1
= control target key start
LH: loop header
LB: loop body
LE: loop exit
PB: predicated region body
PF: predicated region fallthrough
CT: control target
= control target key end

     0   :  { %vm166_vm0 = vcmask 1044480   ;;  %vm117_vm1 = vcmask 39936   ;;  %v3851_v3 = vmov 0   ;;  %vm623_vm2 = vcmask 261120   ;;  %s4732_s3 = inlined_call_operand.vmem [shape: f32[5,32], index: 3, kind: input, shape index: {}]   ;;  %s4733_s2 = inlined_call_operand.vmem [shape: f32[128,5], index: 2, kind: input, shape index: {}]   ;;  %s4734_s1 = inlined_call_operand.vmem [shape: f32[128,1], index: 1, kind: input, shape index: {}]   ;;  %s4735_s0 = inlined_call_operand.vmem [shape: bf16[128,128], index: 0, kind: input, shape index: {}]   ;;  %s4736_s5 = inlined_call_operand.vmem [shape: f32[32,32], index: 5, kind: input, shape index: {}]   ;;  %s4737_s4 = inlined_call_operand.vmem [shape: f32[1,32], index: 4, kind: input, shape index: {}]   ;;  %s4738_s7 = inlined_call_operand.vmem [shape: f32[32,32], index: 7, kind: input, shape index: {}]   ;;  %s4739_s6 = inlined_call_operand.vmem [shape: f32[1,32], index: 6, kind: input, shape index: {}]   ;;  %s4740_s10 = inlined_call_operand.vmem [shape: bf16[128,128], index: 10, kind: input, shape index: {}]   ;;  %s4741_s9 = inlined_call_operand.vmem [shape: bf16[128,128], index: 9, kind: input, shape index: {}]   ;;  %s4742_s8 = inlined_call_operand.vmem [shape: f32[1,32], index: 8, kind: input, shape index: {}]   ;;  %s4743_s13 = inlined_call_operand.vmem [shape: f32[32,32], index: 13, kind: input, shape index: {}]   ;;  %s4744_s12 = inlined_call_operand.vmem [shape: f32[32,32], index: 12, kind: input, shape index: {}]   ;;  %s4745_s16 = inlined_call_operand.vmem [shape: f32[32,32], index: 16, kind: input, shape index: {}]   ;;  %s4746_s14 = inlined_call_operand.vmem [shape: f32[5,32], index: 14, kind: input, shape index: {}]   ;;  %s4747_s11 = inlined_call_operand.vmem [shape: f32[128,5], index: 11, kind: input, shape index: {}]   ;;  %s4748_s15 = inlined_call_operand.vmem [shape: f32[1,32], index: 15, kind: input, shape index: {}]   ;;  %s4749_s19 = inlined_call_operand.<no memory space> [shape: f32[1,1], index: 19, kind: input, shape index: {}]   ;;  %s4750_s17 = inlined_call_operand.vmem [shape: f32[1,32], index: 17, kind: input, shape index: {}]   ;;  %s4751_s18 = inlined_call_operand.vmem [shape: f32[1,32], index: 18, kind: input, shape index: {}]   ;;  %s4752_s20 = inlined_call_operand.vmem [shape: f32[128,1], index: 20, kind: output, shape index: {}]  }
   0x1   :  { %4757 = sst [smem:[#allocation3_spill]] %s4732_s3  ;;  %3761 = vset.pattern.permute.xlu0 %v3851_v3  ;;  %3762 = vset.pattern.permute.xlu1 %v3851_v3  ;;  %vm2808_vm3 = vcmask 7168  }
   0x2   :  { %4758 = sst [smem:[#allocation4_spill]] %s4733_s2  ;;  %s4762_s23 = sld [smem:[#allocation3_spill]] }
   0x3   :  { %4759 = sst [smem:[#allocation5_spill]] %s4734_s1  ;;  %s4763_s25 = sld [smem:[#allocation4_spill]] }
   0x4   :  { %4760 = sst [smem:[#allocation6_spill]] %s4735_s0  ;;  %s4764_s22 = sld [smem:[#allocation5_spill]] }
   0x5   :  { %4761 = sst [smem:[#allocation7_spill]] %s4736_s5  ;;  %s4765_s24 = sld [smem:[#allocation6_spill]] }
   0x6   :  { %s4766_s0 = sld [smem:[#allocation7_spill]] }
   0x8   :  { %v116_v0 = vld [vmem:[%s4762_s23] sm:$0x1f] }
   0x9   :  { %v100_v1 = vld [vmem:[%s4763_s25] sm:$0xff]  ;;  %v101_v2 = vld [vmem:[%s4763_s25 + $0x8] sm:$0xff]  ;;  %3220 = vmatprep.subr.msk.mxu1 %vm166_vm0, %v116_v0  ;;  %v102_v4 = vld [vmem:[%s4763_s25 + $0x10] sm:$0xff] }
   0xa   :  { %3222 = vmatprep.mubr.msk.f32.mxu1 %vm117_vm1, %v100_v1  ;;  %3221 = vmatpush3.msk.msra.mxu1 %vm166_vm0, %v116_v0  ;;  %v103_v5 = vld [vmem:[%s4763_s25 + $0x18] sm:$0xff]  ;;  %v104_v6 = vld [vmem:[%s4763_s25 + $0x20] sm:$0xff]  ;;  %v86_v8 = vld [vmem:[%s4764_s22 + $0x10] sm:$0xff] }
   0xb   :  { %3223 = vmatmul.mubr.msk.f32.vlgmr.msra.gmra.mrb[0].mxu1 %vm117_vm1, %v101_v2  ;;  %v84_v7 = vld [vmem:[%s4764_s22] sm:$0xff]  ;;  %327 = vperm.xlu1 %3762, %v86_v8   ;;  %v85_v9 = vld [vmem:[%s4764_s22 + $0x8] sm:$0xff]  ;;  %v87_v11 = vld [vmem:[%s4764_s22 + $0x18] sm:$0xff] }
   0xc   :  { %3225 = vmatprep.mubr.msk.f32.mxu1 %vm117_vm1, %v102_v4  ;;  %317 = vperm.xlu0 %3761, %v84_v7   ;;  %v105_v10 = vld [vmem:[%s4763_s25 + $0x28] sm:$0xff]  ;;  %v106_v12 = vld [vmem:[%s4763_s25 + $0x30] sm:$0xff]  ;;  %v88_v13 = vld [vmem:[%s4764_s22 + $0x20] sm:$0xff] }
   0xd   :  { %v107_v14 = vld [vmem:[%s4763_s25 + $0x38] sm:$0xff]  ;;  %v89_v15 = vld [vmem:[%s4764_s22 + $0x28] sm:$0xff]  ;;  %v108_v16 = vld [vmem:[%s4763_s25 + $0x40] sm:$0xff] }
   0xe   :  { %v90_v17 = vld [vmem:[%s4764_s22 + $0x30] sm:$0xff]  ;;  %v109_v18 = vld [vmem:[%s4763_s25 + $0x48] sm:$0xff]  ;;  %v91_v19 = vld [vmem:[%s4764_s22 + $0x38] sm:$0xff] }
   0xf   :  { %3226 = vmatmul.mubr.msk.f32.gmra.mrb[2].mxu1 %vm117_vm1, %v103_v5  ;;  %332 = vperm.xlu1 %3762, %v87_v11   ;;  %v110_v20 = vld [vmem:[%s4763_s25 + $0x50] sm:$0xff]  ;;  %v92_v21 = vld [vmem:[%s4764_s22 + $0x40] sm:$0xff]  ;;  %v111_v22 = vld [vmem:[%s4763_s25 + $0x58] sm:$0xff] }
  0x10   :  { %3228 = vmatprep.mubr.msk.f32.mxu1 %vm117_vm1, %v104_v6  ;;  %322 = vperm.xlu0 %3761, %v85_v9   ;;  %v93_v23 = vld [vmem:[%s4764_s22 + $0x48] sm:$0xff]  ;;  %v112_v24 = vld [vmem:[%s4763_s25 + $0x60] sm:$0xff]  ;;  %v94_v25 = vld [vmem:[%s4764_s22 + $0x50] sm:$0xff] }
  0x11   :  { %v113_v26 = vld [vmem:[%s4763_s25 + $0x68] sm:$0xff]  ;;  %v95_v27 = vld [vmem:[%s4764_s22 + $0x58] sm:$0xff]  ;;  %v114_v28 = vld [vmem:[%s4763_s25 + $0x70] sm:$0xff] }
  0x12   :  { %v96_v29 = vld [vmem:[%s4764_s22 + $0x60] sm:$0xff]  ;;  %v115_v30 = vld [vmem:[%s4763_s25 + $0x78] sm:$0xff]  ;;  %v97_v31 = vld [vmem:[%s4764_s22 + $0x68] sm:$0xff] }
  0x13   :  { %3229 = vmatmul.mubr.msk.f32.gmra.mrb[4].mxu1 %vm117_vm1, %v105_v10  ;;  %342 = vperm.xlu1 %3762, %v89_v15   ;;  %v98_v32 = vld [vmem:[%s4764_s22 + $0x70] sm:$0xff]  ;;  %v99_v33 = vld [vmem:[%s4764_s22 + $0x78] sm:$0xff]  ;;  %v4077_v34 = vld [vmem:[%s4765_s24] sm:$0xff]  }
  0x14   :  { %3231 = vmatprep.mubr.msk.f32.mxu1 %vm117_vm1, %v106_v12  ;;  %337 = vperm.xlu0 %3761, %v88_v13  }
  0x17   :  { %3232 = vmatmul.mubr.msk.f32.gmra.mrb[6].mxu1 %vm117_vm1, %v107_v14  ;;  %352 = vperm.xlu1 %3762, %v91_v19  }
  0x18   :  { %3234 = vmatprep.mubr.msk.f32.mxu1 %vm117_vm1, %v108_v16  ;;  %347 = vperm.xlu0 %3761, %v90_v17  }
  0x1b   :  { %3235 = vmatmul.mubr.msk.f32.gmra.mrb[8].mxu1 %vm117_vm1, %v109_v18  ;;  %362 = vperm.xlu1 %3762, %v93_v23  }
  0x1c   :  { %3237 = vmatprep.mubr.msk.f32.mxu1 %vm117_vm1, %v110_v20  ;;  %357 = vperm.xlu0 %3761, %v92_v21  }
  0x1f   :  { %3238 = vmatmul.mubr.msk.f32.gmra.mrb[10].mxu1 %vm117_vm1, %v111_v22  ;;  %372 = vperm.xlu1 %3762, %v95_v27   ;;  %v4131_v27 = vld [vmem:[%s4765_s24 + $0x8] sm:$0xff]  }
  0x20   :  { %3240 = vmatprep.mubr.msk.f32.mxu1 %vm117_vm1, %v112_v24  ;;  %367 = vperm.xlu0 %3761, %v94_v25  }
  0x23   :  { %3241 = vmatmul.mubr.msk.f32.gmra.mrb[12].mxu1 %vm117_vm1, %v113_v26  ;;  %382 = vperm.xlu1 %3762, %v97_v31   ;;  %v4155_v31 = vld [vmem:[%s4765_s24 + $0x28] sm:$0xff]  }
  0x24   :  { %3243 = vmatprep.mubr.msk.f32.mxu1 %vm117_vm1, %v114_v28  ;;  %377 = vperm.xlu0 %3761, %v96_v29   ;;  %v4136_v28 = vld [vmem:[%s4765_s24 + $0x10] sm:$0xff]   ;;  %v4143_v29 = vld [vmem:[%s4765_s24 + $0x18] sm:$0xff]  }
  0x27   :  { %3244 = vmatmul.mubr.msk.f32.gmra.mrb[14].mxu1 %vm117_vm1, %v115_v30  ;;  %392 = vperm.xlu1 %3762, %v99_v33   ;;  %v4148_v30 = vld [vmem:[%s4765_s24 + $0x20] sm:$0xff]   ;;  %v4167_v33 = vld [vmem:[%s4765_s24 + $0x38] sm:$0xff]  }
  0x28   :  { %387 = vperm.xlu0 %3761, %v98_v32   ;;  %3262 = vmatprep.mubr.bf16.mxu1 %v4077_v34  ;;  %v4160_v32 = vld [vmem:[%s4765_s24 + $0x30] sm:$0xff]  }
  0x8a   :  { %v4080_v35 = vpop.permute.xlu1 %327 }
  0x8b   :  { %v4082_v36 = vpop.permute.xlu0 %317 }
  0x8e   :  { %v4084_v37 = vpop.permute.xlu1 %332 }
  0x8f   :  { %v4086_v38 = vpop.permute.xlu0 %322 }
  0x92   :  { %v4088_v39 = vpop.permute.xlu1 %342 }
  0x93   :  { %v4090_v40 = vpop.permute.xlu0 %337 }
  0x96   :  { %v4094_v45 = vpop.permute.xlu1 %352 }
  0x97   :  { %v4096_v48 = vpop.permute.xlu0 %347 }
  0x9a   :  { %v4101_v56 = vpop.permute.xlu1 %362 }
  0x9b   :  { %v4104_v58 = vpop.permute.xlu0 %357 }
  0x9e   :  { %v4108_v0 = vpop.permute.xlu1 %372 }
  0x9f   :  { %v4110_v3 = vpop.permute.xlu0 %367 }
  0xa2   :  { %v4115_v11 = vpop.permute.xlu1 %382 }
  0xa3   :  { %v4118_v13 = vpop.permute.xlu0 %377 }
  0xa6   :  { %v4122_v19 = vpop.permute.xlu1 %392 }
  0xa7   :  { %v4124_v22 = vpop.permute.xlu0 %387 }
  0xde   :  { %v3224_v41 = vpop.f32.mrb[0].mxu1 }
  0xdf   :  { %v396_v42 = vmul.f32 %v3224_v41, %v4086_v38  ;;  %v236_v43 = vpop.f32.mrb[1].mxu1  ;;  %v619_v41 = vld [vmem:[%s4766_s0] sm:$0xff] }
  0xe0   :  { %v395_v44 = vmul.f32 %v4082_v36, %v236_v43 }
  0xe2   :  { %v411_v46 = vpack.c.bf16 %v396_v42, %v395_v44  ;;  %v3227_v47 = vpop.f32.mrb[2].mxu1  ;;  %v620_v42 = vld [vmem:[%s4766_s0 + $0x8] sm:$0xff]  ;;  %v621_v44 = vld [vmem:[%s4766_s0 + $0x10] sm:$0xff] }
  0xe3   :  { %v398_v49 = vmul.f32 %v3227_v47, %v4084_v37  ;;  %v246_v50 = vpop.f32.mrb[3].mxu1  ;;  %v3624_v43 = vpack.c.bf16 %v620_v42, %v619_v41 }
  0xe4   :  { %v397_v51 = vmul.f32 %v4080_v35, %v246_v50  ;;  %3246 = vmatprep.subr.bf16.mxu1 %v411_v46 }
  0xe5   :  { %3247 = vmatpush3.bf16.msra.mxu1 %v411_v46  ;;  %3625 = vmatprep.subr.bf16.mxu0 %v3624_v43  ;;  %v622_v46 = vld [vmem:[%s4766_s0 + $0x18] sm:$0xff] }
  0xe6   :  { %v412_v52 = vpack.c.bf16 %v398_v49, %v397_v51  ;;  %v3230_v53 = vpop.f32.mrb[4].mxu1  ;;  %3627 = vmatpush3.bf16.msra.mxu0 %v3624_v43  ;;  %v3628_v47 = vpack.c.bf16 %v622_v46, %v621_v44  ;;  %v4187_v51 = vld [vmem:[%s4737_s4] ss:$0 sm:$0xff] }
  0xe7   :  { %v400_v54 = vmul.f32 %v3230_v53, %v4088_v39  ;;  %v256_v55 = vpop.f32.mrb[5].mxu1 }
  0xe8   :  { %v399_v57 = vmul.f32 %v4090_v40, %v256_v55  ;;  %3248 = vmatprep.subr.bf16.mxu1 %v412_v52  ;;  %3629 = vmatprep.subr.bf16.mxu0 %v3628_v47 }
  0xe9   :  { %3249 = vmatpush3.bf16.msra.mxu1 %v412_v52 }
  0xea   :  { %v413_v59 = vpack.c.bf16 %v400_v54, %v399_v57  ;;  %v3233_v60 = vpop.f32.mrb[6].mxu1  ;;  %3631 = vmatpush3.bf16.msra.mxu0 %v3628_v47 }
  0xeb   :  { %v402_v61 = vmul.f32 %v3233_v60, %v4094_v45  ;;  %v266_v62 = vpop.f32.mrb[7].mxu1 }
  0xec   :  { %v401_v63 = vmul.f32 %v4096_v48, %v266_v62  ;;  %3250 = vmatprep.subr.bf16.mxu1 %v413_v59 }
  0xed   :  { %3251 = vmatpush3.bf16.msra.mxu1 %v413_v59 }
  0xee   :  { %v414_v1 = vpack.c.bf16 %v402_v61, %v401_v63  ;;  %v3236_v2 = vpop.f32.mrb[8].mxu1 }
  0xef   :  { %v404_v4 = vmul.f32 %v3236_v2, %v4101_v56  ;;  %v276_v5 = vpop.f32.mrb[9].mxu1 }
  0xf0   :  { %v403_v6 = vmul.f32 %v4104_v58, %v276_v5  ;;  %3252 = vmatprep.subr.bf16.mxu1 %v414_v1 }
  0xf1   :  { %3253 = vmatpush3.bf16.msra.mxu1 %v414_v1 }
  0xf2   :  { %v415_v7 = vpack.c.bf16 %v404_v4, %v403_v6  ;;  %v3239_v8 = vpop.f32.mrb[10].mxu1 }
  0xf3   :  { %v406_v9 = vmul.f32 %v3239_v8, %v4108_v0  ;;  %v286_v10 = vpop.f32.mrb[11].mxu1 }
  0xf4   :  { %v405_v12 = vmul.f32 %v4110_v3, %v286_v10  ;;  %3254 = vmatprep.subr.bf16.mxu1 %v415_v7 }
  0xf5   :  { %3255 = vmatpush3.bf16.msra.mxu1 %v415_v7 }
  0xf6   :  { %v416_v14 = vpack.c.bf16 %v406_v9, %v405_v12  ;;  %v3242_v15 = vpop.f32.mrb[12].mxu1 }
  0xf7   :  { %v408_v16 = vmul.f32 %v3242_v15, %v4115_v11  ;;  %v296_v17 = vpop.f32.mrb[13].mxu1 }
  0xf8   :  { %v407_v18 = vmul.f32 %v4118_v13, %v296_v17  ;;  %3256 = vmatprep.subr.bf16.mxu1 %v416_v14 }
  0xf9   :  { %3257 = vmatpush3.bf16.msra.mxu1 %v416_v14 }
  0xfa   :  { %v417_v20 = vpack.c.bf16 %v408_v16, %v407_v18  ;;  %v3245_v21 = vpop.f32.mrb[14].mxu1 }
  0xfb   :  { %v410_v23 = vmul.f32 %v3245_v21, %v4122_v19  ;;  %v306_v24 = vpop.f32.mrb[15].mxu1 }
  0xfc   :  { %v409_v25 = vmul.f32 %v4124_v22, %v306_v24  ;;  %3258 = vmatprep.subr.bf16.mxu1 %v417_v20 }
  0xfd   :  { %3259 = vmatpush3.bf16.msra.mxu1 %v417_v20 }
  0xfe   :  { %v418_v26 = vpack.c.bf16 %v410_v23, %v409_v25 }
 0x100   :  { %3260 = vmatprep.subr.bf16.mxu1 %v418_v26 }
 0x101   :  { %3261 = vmatpush3.bf16.msra.mxu1 %v418_v26 }
 0x104   :  { %3263 = vmatmul.mubr.bf16.vlgmr.msra.gmra.mrb[16].mxu1 %v4131_v27 }
 0x105   :  { %3266 = vmatprep.mubr.bf16.mxu1 %v4136_v28 }
 0x10c   :  { %3267 = vmatmul.mubr.bf16.gmra.mrb[20].mxu1 %v4143_v29 }
 0x10d   :  { %3270 = vmatprep.mubr.bf16.mxu1 %v4148_v30 }
 0x114   :  { %3271 = vmatmul.mubr.bf16.gmra.mrb[24].mxu1 %v4155_v31 }
 0x115   :  { %3274 = vmatprep.mubr.bf16.mxu1 %v4160_v32 }
 0x11c   :  { %3275 = vmatmul.mubr.bf16.gmra.mrb[28].mxu1 %v4167_v33 }
 0x11d   :  { %3326 = vmatprep.mubr.bf16.mxu1 %v4077_v34 }
 0x1d7   :  { %v3264_v49 = vpop.f32.mrb[16].mxu1 }
 0x1d8   :  { %v566_v50 = vmul.f32 %v3264_v49, %v4080_v35  ;;  %v501_v52 = vpop.f32.mrb[17].mxu1 }
 0x1d9   :  { %v564_v53 = vmul.f32 %v501_v52, %v4082_v36  ;;  %v3265_v54 = vpop.f32.mrb[18].mxu1 }
 0x1da   :  { %v504_v55 = vpop.f32.mrb[19].mxu1  ;;  %v567_v57 = vmul.f32 %v3265_v54, %v4084_v37  ;;  %v589_v61 = vadd.f32 %v4187_v51, %v566_v50 }
 0x1db   :  { %v565_v59 = vmul.f32 %v504_v55, %v4086_v38  ;;  %v587_v60 = vadd.f32 %v4187_v51, %v564_v53 }
 0x1dc   :  { %v590_v1 = vadd.f32 %v4187_v51, %v567_v57  ;;  %v605_v5 = vmax.f32 %v589_v61, 0.0 }
 0x1dd   :  { %v588_v62 = vadd.f32 %v4187_v51, %v565_v59  ;;  %v603_v63 = vmax.f32 %v587_v60, 0.0 }
 0x1de   :  { %v606_v12 = vmax.f32 %v590_v1, 0.0 }
 0x1df   :  { %v604_v2 = vmax.f32 %v588_v62, 0.0  ;;  %v3268_v4 = vpop.f32.mrb[20].mxu1  ;;  %3286 = vmatprep.mubr.msk.f32.mxu0 %vm623_vm2, %v603_v63 }
 0x1e0   :  { %v570_v6 = vmul.f32 %v3268_v4, %v4096_v48  ;;  %v517_v7 = vpop.f32.mrb[21].mxu1 }
 0x1e1   :  { %v568_v8 = vmul.f32 %v517_v7, %v4090_v40  ;;  %v3269_v9 = vpop.f32.mrb[22].mxu1  ;;  %3287 = vmatmul.mubr.msk.f32.vlgmr.msra.gmra.mrb[0].mxu0 %vm623_vm2, %v604_v2 }
 0x1e2   :  { %v520_v10 = vpop.f32.mrb[23].mxu1  ;;  %3289 = vmatprep.mubr.msk.f32.mxu0 %vm623_vm2, %v605_v5  ;;  %v571_v15 = vmul.f32 %v3269_v9, %v4094_v45  ;;  %v593_v17 = vadd.f32 %v4187_v51, %v570_v6 }
 0x1e3   :  { %v591_v14 = vadd.f32 %v4187_v51, %v568_v8  ;;  %v569_v16 = vmul.f32 %v520_v10, %v4088_v39 }
 0x1e4   :  { %v594_v21 = vadd.f32 %v4187_v51, %v571_v15  ;;  %v609_v25 = vmax.f32 %v593_v17, 0.0  ;;  %v993_v17 = vld [vmem:[%s4738_s7] sm:$0xff] }
 0x1e5   :  { %v607_v18 = vmax.f32 %v591_v14, 0.0  ;;  %v592_v20 = vadd.f32 %v4187_v51, %v569_v16  ;;  %3290 = vmatmul.mubr.msk.f32.gmra.mrb[2].mxu0 %vm623_vm2, %v606_v12 }
 0x1e6   :  { %v610_v46 = vmax.f32 %v594_v21, 0.0  ;;  %v996_v21 = vld [vmem:[%s4738_s7 + $0x18] sm:$0xff] }
 0x1e7   :  { %v608_v23 = vmax.f32 %v592_v20, 0.0  ;;  %v3272_v24 = vpop.f32.mrb[24].mxu1  ;;  %3292 = vmatprep.mubr.msk.f32.mxu0 %vm623_vm2, %v607_v18  ;;  %v994_v18 = vld [vmem:[%s4738_s7 + $0x8] sm:$0xff] }
 0x1e8   :  { %v574_v26 = vmul.f32 %v3272_v24, %v4110_v3  ;;  %v533_v41 = vpop.f32.mrb[25].mxu1  ;;  %v3632_v20 = vpack.c.bf16 %v994_v18, %v993_v17 }
 0x1e9   :  { %v572_v42 = vmul.f32 %v533_v41, %v4104_v58  ;;  %v3273_v43 = vpop.f32.mrb[26].mxu1  ;;  %3293 = vmatmul.mubr.msk.f32.gmra.mrb[4].mxu0 %vm623_vm2, %v608_v23 }
 0x1ea   :  { %v536_v44 = vpop.f32.mrb[27].mxu1  ;;  %3295 = vmatprep.mubr.msk.f32.mxu0 %vm623_vm2, %v609_v25  ;;  %v575_v49 = vmul.f32 %v3273_v43, %v4108_v0  ;;  %v597_v52 = vadd.f32 %v4187_v51, %v574_v26  ;;  %3633 = vmatprep.subr.bf16.mxu0 %v3632_v20 }
 0x1eb   :  { %v595_v47 = vadd.f32 %v4187_v51, %v572_v42  ;;  %v573_v50 = vmul.f32 %v536_v44, %v4101_v56  ;;  %3635 = vmatpush3.bf16.msra.mxu0 %v3632_v20 }
 0x1ec   :  { %v598_v55 = vadd.f32 %v4187_v51, %v575_v49  ;;  %v613_v60 = vmax.f32 %v597_v52, 0.0 }
 0x1ed   :  { %v611_v53 = vmax.f32 %v595_v47, 0.0  ;;  %v596_v54 = vadd.f32 %v4187_v51, %v573_v50  ;;  %3296 = vmatmul.mubr.msk.f32.gmra.mrb[6].mxu0 %vm623_vm2, %v610_v46 }
 0x1ee   :  { %v614_v4 = vmax.f32 %v598_v55, 0.0 }
 0x1ef   :  { %v612_v57 = vmax.f32 %v596_v54, 0.0  ;;  %v3276_v59 = vpop.f32.mrb[28].mxu1  ;;  %3298 = vmatprep.mubr.msk.f32.mxu0 %vm623_vm2, %v611_v53 }
 0x1f0   :  { %v578_v61 = vmul.f32 %v3276_v59, %v4124_v22  ;;  %v549_v62 = vpop.f32.mrb[29].mxu1 }
 0x1f1   :  { %v576_v63 = vmul.f32 %v549_v62, %v4118_v13  ;;  %v3277_v1 = vpop.f32.mrb[30].mxu1  ;;  %3299 = vmatmul.mubr.msk.f32.gmra.mrb[8].mxu0 %vm623_vm2, %v612_v57 }
 0x1f2   :  { %v552_v2 = vpop.f32.mrb[31].mxu1  ;;  %3301 = vmatprep.mubr.msk.f32.mxu0 %vm623_vm2, %v613_v60  ;;  %v579_v6 = vmul.f32 %v3277_v1, %v4122_v19  ;;  %v601_v8 = vadd.f32 %v4187_v51, %v578_v61 }
 0x1f3   :  { %v599_v5 = vadd.f32 %v4187_v51, %v576_v63  ;;  %v577_v7 = vmul.f32 %v552_v2, %v4115_v11 }
 0x1f4   :  { %v602_v12 = vadd.f32 %v4187_v51, %v579_v6  ;;  %v617_v15 = vmax.f32 %v601_v8, 0.0 }
 0x1f5   :  { %v615_v9 = vmax.f32 %v599_v5, 0.0  ;;  %v600_v10 = vadd.f32 %v4187_v51, %v577_v7  ;;  %3302 = vmatmul.mubr.msk.f32.gmra.mrb[10].mxu0 %vm623_vm2, %v614_v4  ;;  %v995_v51 = vld [vmem:[%s4738_s7 + $0x10] sm:$0xff] }
 0x1f6   :  { %v618_v16 = vmax.f32 %v602_v12, 0.0  ;;  %v3636_v23 = vpack.c.bf16 %v996_v21, %v995_v51 }
 0x1f7   :  { %v616_v14 = vmax.f32 %v600_v10, 0.0  ;;  %3304 = vmatprep.mubr.msk.f32.mxu0 %vm623_vm2, %v615_v9 }
 0x1f8   :  { %3637 = vmatprep.subr.bf16.mxu0 %v3636_v23 }
 0x1f9   :  { %3305 = vmatmul.mubr.msk.f32.gmra.mrb[12].mxu0 %vm623_vm2, %v616_v14 }
 0x1fa   :  { %3307 = vmatprep.mubr.msk.f32.mxu0 %vm623_vm2, %v617_v15  ;;  %3639 = vmatpush3.bf16.msra.mxu0 %v3636_v23 }
 0x1fd   :  { %3308 = vmatmul.mubr.msk.f32.gmra.mrb[14].mxu0 %vm623_vm2, %v618_v16 }
 0x2b4   :  { %v3288_v24 = vpop.f32.mrb[0].mxu0 }
 0x2b5   :  { %v818_v25 = vmul.f32 %v3288_v24, %v4086_v38  ;;  %v738_v26 = vpop.f32.mrb[1].mxu0 }
 0x2b6   :  { %v817_v41 = vmul.f32 %v738_v26, %v4082_v36  ;;  %v4276_v26 = vld [vmem:[%s4739_s6] ss:$0 sm:$0xff] }
 0x2b8   :  { %v833_v42 = vpack.c.bf16 %v818_v25, %v817_v41  ;;  %v3291_v43 = vpop.f32.mrb[2].mxu0 }
 0x2b9   :  { %v820_v44 = vmul.f32 %v3291_v43, %v4084_v37  ;;  %v748_v46 = vpop.f32.mrb[3].mxu0 }
 0x2ba   :  { %v819_v47 = vmul.f32 %v748_v46, %v4080_v35  ;;  %3310 = vmatprep.subr.bf16.mxu1 %v833_v42 }
 0x2bb   :  { %3311 = vmatpush3.bf16.msra.mxu1 %v833_v42 }
 0x2bc   :  { %v834_v49 = vpack.c.bf16 %v820_v44, %v819_v47  ;;  %v3294_v50 = vpop.f32.mrb[4].mxu0 }
 0x2bd   :  { %v822_v52 = vmul.f32 %v3294_v50, %v4088_v39  ;;  %v758_v53 = vpop.f32.mrb[5].mxu0 }
 0x2be   :  { %v821_v54 = vmul.f32 %v758_v53, %v4090_v40  ;;  %3312 = vmatprep.subr.bf16.mxu1 %v834_v49 }
 0x2bf   :  { %3313 = vmatpush3.bf16.msra.mxu1 %v834_v49 }
 0x2c0   :  { %v835_v55 = vpack.c.bf16 %v822_v52, %v821_v54  ;;  %v3297_v57 = vpop.f32.mrb[6].mxu0 }
 0x2c1   :  { %v824_v59 = vmul.f32 %v3297_v57, %v4094_v45  ;;  %v768_v60 = vpop.f32.mrb[7].mxu0 }
 0x2c2   :  { %v823_v61 = vmul.f32 %v768_v60, %v4096_v48  ;;  %3314 = vmatprep.subr.bf16.mxu1 %v835_v55 }
 0x2c3   :  { %3315 = vmatpush3.bf16.msra.mxu1 %v835_v55 }
 0x2c4   :  { %v836_v62 = vpack.c.bf16 %v824_v59, %v823_v61  ;;  %v3300_v63 = vpop.f32.mrb[8].mxu0 }
 0x2c5   :  { %v826_v1 = vmul.f32 %v3300_v63, %v4101_v56  ;;  %v778_v2 = vpop.f32.mrb[9].mxu0 }
 0x2c6   :  { %v825_v4 = vmul.f32 %v778_v2, %v4104_v58  ;;  %3316 = vmatprep.subr.bf16.mxu1 %v836_v62 }
 0x2c7   :  { %3317 = vmatpush3.bf16.msra.mxu1 %v836_v62 }
 0x2c8   :  { %v837_v5 = vpack.c.bf16 %v826_v1, %v825_v4  ;;  %v3303_v6 = vpop.f32.mrb[10].mxu0 }
 0x2c9   :  { %v828_v7 = vmul.f32 %v3303_v6, %v4108_v0  ;;  %v788_v8 = vpop.f32.mrb[11].mxu0 }
 0x2ca   :  { %v827_v9 = vmul.f32 %v788_v8, %v4110_v3  ;;  %3318 = vmatprep.subr.bf16.mxu1 %v837_v5 }
 0x2cb   :  { %3319 = vmatpush3.bf16.msra.mxu1 %v837_v5 }
 0x2cc   :  { %v838_v10 = vpack.c.bf16 %v828_v7, %v827_v9  ;;  %v3306_v12 = vpop.f32.mrb[12].mxu0 }
 0x2cd   :  { %v830_v14 = vmul.f32 %v3306_v12, %v4115_v11  ;;  %v798_v15 = vpop.f32.mrb[13].mxu0 }
 0x2ce   :  { %v829_v16 = vmul.f32 %v798_v15, %v4118_v13  ;;  %3320 = vmatprep.subr.bf16.mxu1 %v838_v10 }
 0x2cf   :  { %3321 = vmatpush3.bf16.msra.mxu1 %v838_v10 }
 0x2d0   :  { %v839_v17 = vpack.c.bf16 %v830_v14, %v829_v16  ;;  %v3309_v18 = vpop.f32.mrb[14].mxu0 }
 0x2d1   :  { %v832_v51 = vmul.f32 %v3309_v18, %v4122_v19  ;;  %v808_v20 = vpop.f32.mrb[15].mxu0 }
 0x2d2   :  { %v831_v21 = vmul.f32 %v808_v20, %v4124_v22  ;;  %3322 = vmatprep.subr.bf16.mxu1 %v839_v17 }
 0x2d3   :  { %3323 = vmatpush3.bf16.msra.mxu1 %v839_v17 }
 0x2d4   :  { %v840_v23 = vpack.c.bf16 %v832_v51, %v831_v21 }
 0x2d6   :  { %3324 = vmatprep.subr.bf16.mxu1 %v840_v23 }
 0x2d7   :  { %3325 = vmatpush3.bf16.msra.mxu1 %v840_v23 }
 0x2da   :  { %3327 = vmatmul.mubr.bf16.vlgmr.msra.gmra.mrb[32].mxu1 %v4131_v27 }
 0x2db   :  { %3330 = vmatprep.mubr.bf16.mxu1 %v4136_v28 }
 0x2e2   :  { %3331 = vmatmul.mubr.bf16.gmra.mrb[36].mxu1 %v4143_v29 }
 0x2e3   :  { %3334 = vmatprep.mubr.bf16.mxu1 %v4148_v30 }
 0x2ea   :  { %3335 = vmatmul.mubr.bf16.gmra.mrb[40].mxu1 %v4155_v31 }
 0x2eb   :  { %3338 = vmatprep.mubr.bf16.mxu1 %v4160_v32 }
 0x2f2   :  { %3339 = vmatmul.mubr.bf16.gmra.mrb[44].mxu1 %v4167_v33 }
 0x2f3   :  { %3390 = vmatprep.mubr.bf16.mxu1 %v4077_v34 }
 0x3ad   :  { %v3328_v24 = vpop.f32.mrb[32].mxu1 }
 0x3ae   :  { %v940_v25 = vmul.f32 %v3328_v24, %v4080_v35  ;;  %v875_v41 = vpop.f32.mrb[33].mxu1 }
 0x3af   :  { %v938_v42 = vmul.f32 %v875_v41, %v4082_v36  ;;  %v3329_v43 = vpop.f32.mrb[34].mxu1 }
 0x3b0   :  { %v878_v44 = vpop.f32.mrb[35].mxu1  ;;  %v941_v47 = vmul.f32 %v3329_v43, %v4084_v37  ;;  %v963_v34 = vadd.f32 %v4276_v26, %v940_v25 }
 0x3b1   :  { %v961_v46 = vadd.f32 %v4276_v26, %v938_v42  ;;  %v939_v49 = vmul.f32 %v878_v44, %v4086_v38 }
 0x3b2   :  { %v964_v53 = vadd.f32 %v4276_v26, %v941_v47  ;;  %v979_v57 = vmax.f32 %v963_v34, 0.0 }
 0x3b3   :  { %v977_v50 = vmax.f32 %v961_v46, 0.0  ;;  %v962_v52 = vadd.f32 %v4276_v26, %v939_v49 }
 0x3b4   :  { %v980_v1 = vmax.f32 %v964_v53, 0.0 }
 0x3b5   :  { %v978_v54 = vmax.f32 %v962_v52, 0.0  ;;  %v3332_v55 = vpop.f32.mrb[36].mxu1  ;;  %3350 = vmatprep.mubr.msk.f32.mxu0 %vm623_vm2, %v977_v50 }
 0x3b6   :  { %v944_v59 = vmul.f32 %v3332_v55, %v4096_v48  ;;  %v891_v60 = vpop.f32.mrb[37].mxu1 }
 0x3b7   :  { %v942_v61 = vmul.f32 %v891_v60, %v4090_v40  ;;  %v3333_v62 = vpop.f32.mrb[38].mxu1  ;;  %3351 = vmatmul.mubr.msk.f32.vlgmr.msra.gmra.mrb[16].mxu0 %vm623_vm2, %v978_v54 }
 0x3b8   :  { %v894_v63 = vpop.f32.mrb[39].mxu1  ;;  %3353 = vmatprep.mubr.msk.f32.mxu0 %vm623_vm2, %v979_v57  ;;  %v945_v4 = vmul.f32 %v3333_v62, %v4094_v45  ;;  %v967_v6 = vadd.f32 %v4276_v26, %v944_v59 }
 0x3b9   :  { %v965_v2 = vadd.f32 %v4276_v26, %v942_v61  ;;  %v943_v5 = vmul.f32 %v894_v63, %v4088_v39 }
 0x3ba   :  { %v968_v9 = vadd.f32 %v4276_v26, %v945_v4  ;;  %v983_v14 = vmax.f32 %v967_v6, 0.0 }
 0x3bb   :  { %v981_v7 = vmax.f32 %v965_v2, 0.0  ;;  %v966_v8 = vadd.f32 %v4276_v26, %v943_v5  ;;  %3354 = vmatmul.mubr.msk.f32.gmra.mrb[18].mxu0 %vm623_vm2, %v980_v1 }
 0x3bc   :  { %v984_v20 = vmax.f32 %v968_v9, 0.0 }
 0x3bd   :  { %v982_v10 = vmax.f32 %v966_v8, 0.0  ;;  %v3336_v12 = vpop.f32.mrb[40].mxu1  ;;  %3356 = vmatprep.mubr.msk.f32.mxu0 %vm623_vm2, %v981_v7 }
 0x3be   :  { %v948_v15 = vmul.f32 %v3336_v12, %v4110_v3  ;;  %v907_v16 = vpop.f32.mrb[41].mxu1 }
 0x3bf   :  { %v946_v17 = vmul.f32 %v907_v16, %v4104_v58  ;;  %v3337_v18 = vpop.f32.mrb[42].mxu1  ;;  %3357 = vmatmul.mubr.msk.f32.gmra.mrb[20].mxu0 %vm623_vm2, %v982_v10 }
 0x3c0   :  { %v910_v51 = vpop.f32.mrb[43].mxu1  ;;  %3359 = vmatprep.mubr.msk.f32.mxu0 %vm623_vm2, %v983_v14  ;;  %v949_v23 = vmul.f32 %v3337_v18, %v4108_v0  ;;  %v971_v25 = vadd.f32 %v4276_v26, %v948_v15 }
 0x3c1   :  { %v969_v21 = vadd.f32 %v4276_v26, %v946_v17  ;;  %v947_v24 = vmul.f32 %v910_v51, %v4101_v56 }
 0x3c2   :  { %v972_v43 = vadd.f32 %v4276_v26, %v949_v23  ;;  %v987_v47 = vmax.f32 %v971_v25, 0.0 }
 0x3c3   :  { %v985_v41 = vmax.f32 %v969_v21, 0.0  ;;  %v970_v42 = vadd.f32 %v4276_v26, %v947_v24  ;;  %3360 = vmatmul.mubr.msk.f32.gmra.mrb[22].mxu0 %vm623_vm2, %v984_v20 }
 0x3c4   :  { %v988_v54 = vmax.f32 %v972_v43, 0.0 }
 0x3c5   :  { %v986_v44 = vmax.f32 %v970_v42, 0.0  ;;  %v3340_v46 = vpop.f32.mrb[44].mxu1  ;;  %3362 = vmatprep.mubr.msk.f32.mxu0 %vm623_vm2, %v985_v41 }
 0x3c6   :  { %v952_v49 = vmul.f32 %v3340_v46, %v4124_v22  ;;  %v923_v34 = vpop.f32.mrb[45].mxu1 }
 0x3c7   :  { %v950_v50 = vmul.f32 %v923_v34, %v4118_v13  ;;  %v3341_v52 = vpop.f32.mrb[46].mxu1  ;;  %3363 = vmatmul.mubr.msk.f32.gmra.mrb[24].mxu0 %vm623_vm2, %v986_v44 }
 0x3c8   :  { %v926_v53 = vpop.f32.mrb[47].mxu1  ;;  %3365 = vmatprep.mubr.msk.f32.mxu0 %vm623_vm2, %v987_v47  ;;  %v953_v57 = vmul.f32 %v3341_v52, %v4122_v19  ;;  %v975_v60 = vadd.f32 %v4276_v26, %v952_v49 }
 0x3c9   :  { %v973_v55 = vadd.f32 %v4276_v26, %v950_v50  ;;  %v951_v59 = vmul.f32 %v926_v53, %v4115_v11 }
 0x3ca   :  { %v976_v63 = vadd.f32 %v4276_v26, %v953_v57  ;;  %v991_v2 = vmax.f32 %v975_v60, 0.0 }
 0x3cb   :  { %v989_v61 = vmax.f32 %v973_v55, 0.0  ;;  %v974_v62 = vadd.f32 %v4276_v26, %v951_v59  ;;  %3366 = vmatmul.mubr.msk.f32.gmra.mrb[26].mxu0 %vm623_vm2, %v988_v54 }
 0x3cc   :  { %v992_v4 = vmax.f32 %v976_v63, 0.0 }
 0x3cd   :  { %v990_v1 = vmax.f32 %v974_v62, 0.0  ;;  %3368 = vmatprep.mubr.msk.f32.mxu0 %vm623_vm2, %v989_v61 }
 0x3cf   :  { %3369 = vmatmul.mubr.msk.f32.gmra.mrb[28].mxu0 %vm623_vm2, %v990_v1 }
 0x3d0   :  { %3371 = vmatprep.mubr.msk.f32.mxu0 %vm623_vm2, %v991_v2 }
 0x3d3   :  { %3372 = vmatmul.mubr.msk.f32.gmra.mrb[30].mxu0 %vm623_vm2, %v992_v4  ;;  %v3771_v4 = vld [vmem:[%s4740_s10] sm:$0xff]  }
 0x48a   :  { %v3352_v5 = vpop.f32.mrb[16].mxu0 }
 0x48b   :  { %v1191_v6 = vmul.f32 %v3352_v5, %v4086_v38  ;;  %v1111_v7 = vpop.f32.mrb[17].mxu0 }
 0x48c   :  { %v1190_v8 = vmul.f32 %v1111_v7, %v4082_v36 }
 0x48e   :  { %v1206_v9 = vpack.c.bf16 %v1191_v6, %v1190_v8  ;;  %v3355_v10 = vpop.f32.mrb[18].mxu0 }
 0x48f   :  { %v1193_v26 = vmul.f32 %v3355_v10, %v4084_v37  ;;  %v1121_v12 = vpop.f32.mrb[19].mxu0 }
 0x490   :  { %v1192_v14 = vmul.f32 %v1121_v12, %v4080_v35  ;;  %3374 = vmatprep.subr.bf16.mxu1 %v1206_v9 }
 0x491   :  { %3375 = vmatpush3.bf16.msra.mxu1 %v1206_v9 }
 0x492   :  { %v1207_v15 = vpack.c.bf16 %v1193_v26, %v1192_v14  ;;  %v3358_v16 = vpop.f32.mrb[20].mxu0 }
 0x493   :  { %v1195_v17 = vmul.f32 %v3358_v16, %v4088_v39  ;;  %v1131_v18 = vpop.f32.mrb[21].mxu0 }
 0x494   :  { %v1194_v51 = vmul.f32 %v1131_v18, %v4090_v40  ;;  %3376 = vmatprep.subr.bf16.mxu1 %v1207_v15 }
 0x495   :  { %3377 = vmatpush3.bf16.msra.mxu1 %v1207_v15 }
 0x496   :  { %v1208_v20 = vpack.c.bf16 %v1195_v17, %v1194_v51  ;;  %v3361_v21 = vpop.f32.mrb[22].mxu0 }
 0x497   :  { %v1197_v23 = vmul.f32 %v3361_v21, %v4094_v45  ;;  %v1141_v24 = vpop.f32.mrb[23].mxu0 }
 0x498   :  { %v1196_v25 = vmul.f32 %v1141_v24, %v4096_v48  ;;  %3378 = vmatprep.subr.bf16.mxu1 %v1208_v20 }
 0x499   :  { %3379 = vmatpush3.bf16.msra.mxu1 %v1208_v20 }
 0x49a   :  { %v1209_v41 = vpack.c.bf16 %v1197_v23, %v1196_v25  ;;  %v3364_v42 = vpop.f32.mrb[24].mxu0 }
 0x49b   :  { %v1199_v43 = vmul.f32 %v3364_v42, %v4101_v56  ;;  %v1151_v44 = vpop.f32.mrb[25].mxu0 }
 0x49c   :  { %v1198_v46 = vmul.f32 %v1151_v44, %v4104_v58  ;;  %3380 = vmatprep.subr.bf16.mxu1 %v1209_v41 }
 0x49d   :  { %3381 = vmatpush3.bf16.msra.mxu1 %v1209_v41 }
 0x49e   :  { %v1210_v47 = vpack.c.bf16 %v1199_v43, %v1198_v46  ;;  %v3367_v49 = vpop.f32.mrb[26].mxu0 }
 0x49f   :  { %v1201_v34 = vmul.f32 %v3367_v49, %v4108_v0  ;;  %v1161_v50 = vpop.f32.mrb[27].mxu0 }
 0x4a0   :  { %v1200_v52 = vmul.f32 %v1161_v50, %v4110_v3  ;;  %3382 = vmatprep.subr.bf16.mxu1 %v1210_v47 }
 0x4a1   :  { %3383 = vmatpush3.bf16.msra.mxu1 %v1210_v47 }
 0x4a2   :  { %v1211_v53 = vpack.c.bf16 %v1201_v34, %v1200_v52  ;;  %v3370_v54 = vpop.f32.mrb[28].mxu0 }
 0x4a3   :  { %v1203_v55 = vmul.f32 %v3370_v54, %v4115_v11  ;;  %v1171_v57 = vpop.f32.mrb[29].mxu0 }
 0x4a4   :  { %v1202_v59 = vmul.f32 %v1171_v57, %v4118_v13  ;;  %3384 = vmatprep.subr.bf16.mxu1 %v1211_v53 }
 0x4a5   :  { %3385 = vmatpush3.bf16.msra.mxu1 %v1211_v53 }
 0x4a6   :  { %v1212_v60 = vpack.c.bf16 %v1203_v55, %v1202_v59  ;;  %v3373_v61 = vpop.f32.mrb[30].mxu0 }
 0x4a7   :  { %v1205_v62 = vmul.f32 %v3373_v61, %v4122_v19  ;;  %v1181_v63 = vpop.f32.mrb[31].mxu0 }
 0x4a8   :  { %v1204_v1 = vmul.f32 %v1181_v63, %v4124_v22  ;;  %3386 = vmatprep.subr.bf16.mxu1 %v1212_v60 }
 0x4a9   :  { %3387 = vmatpush3.bf16.msra.mxu1 %v1212_v60 }
 0x4aa   :  { %v1213_v2 = vpack.c.bf16 %v1205_v62, %v1204_v1  ;;  %v3772_v1 = vld [vmem:[%s4740_s10 + $0x8] sm:$0xff]  }
 0x4ac   :  { %3388 = vmatprep.subr.bf16.mxu1 %v1213_v2 }
 0x4ad   :  { %3389 = vmatpush3.bf16.msra.mxu1 %v1213_v2  ;;  %v3780_v2 = vld [vmem:[%s4741_s9 + $0x8] sm:$0xff]  }
 0x4b0   :  { %3391 = vmatmul.mubr.bf16.vlgmr.msra.gmra.mrb[48].mxu1 %v4131_v27  ;;  %v3779_v27 = vld [vmem:[%s4741_s9] sm:$0xff]  }
 0x4b1   :  { %3394 = vmatprep.mubr.bf16.mxu1 %v4136_v28  ;;  %3438 = vmatprep.mubr.bf16.mxu0 %v3779_v27  ;;  %v1743_v27 = vld [vmem:[%s4743_s13 + $0x18] sm:$0xff] }
 0x4b8   :  { %3395 = vmatmul.mubr.bf16.gmra.mrb[52].mxu1 %v4143_v29 }
 0x4b9   :  { %3398 = vmatprep.mubr.bf16.mxu1 %v4148_v30 }
 0x4c0   :  { %3399 = vmatmul.mubr.bf16.gmra.mrb[56].mxu1 %v4155_v31  ;;  %v4358_v31 = vld [vmem:[%s4742_s8] ss:$0 sm:$0xff] }
 0x4c1   :  { %3402 = vmatprep.mubr.bf16.mxu1 %v4160_v32 }
 0x4c8   :  { %3403 = vmatmul.mubr.bf16.gmra.mrb[60].mxu1 %v4167_v33 }
 0x4c9   :  { %3486 = vmatprep.mubr.bf16.mxu1 %v3771_v4  ;;  %v1742_v4 = vld [vmem:[%s4743_s13 + $0x10] sm:$0xff] }
 0x583   :  { %v3392_v28 = vpop.f32.mrb[48].mxu1 }
 0x584   :  { %v1313_v29 = vmul.f32 %v3392_v28, %v4080_v35  ;;  %v1248_v30 = vpop.f32.mrb[49].mxu1  ;;  %v3773_v28 = vld [vmem:[%s4740_s10 + $0x10] sm:$0xff]  }
 0x585   :  { %v1311_v32 = vmul.f32 %v1248_v30, %v4082_v36  ;;  %v3393_v33 = vpop.f32.mrb[50].mxu1  ;;  %v3708_v30 = vpack.c.bf16 %v1743_v27, %v1742_v4  ;;  %v2134_v4 = vld [vmem:[%s4747_s11 + $0x20] sm:$0xff]  ;;  %v2135_v27 = vld [vmem:[%s4747_s11 + $0x28] sm:$0xff] }
 0x586   :  { %v1314_v5 = vmul.f32 %v3393_v33, %v4084_v37  ;;  %v1251_v6 = vpop.f32.mrb[51].mxu1  ;;  %v1336_v8 = vadd.f32 %v4358_v31, %v1313_v29  ;;  %v3781_v29 = vld [vmem:[%s4741_s9 + $0x10] sm:$0xff]   ;;  %v3775_v33 = vld [vmem:[%s4740_s10 + $0x20] sm:$0xff]  }
 0x587   :  { %v1312_v7 = vmul.f32 %v1251_v6, %v4086_v38  ;;  %v1334_v35 = vadd.f32 %v4358_v31, %v1311_v32  ;;  %v3782_v32 = vld [vmem:[%s4741_s9 + $0x18] sm:$0xff]   ;;  %v3776_v6 = vld [vmem:[%s4740_s10 + $0x28] sm:$0xff]  }
 0x588   :  { %v1337_v9 = vadd.f32 %v4358_v31, %v1314_v5  ;;  %v3783_v5 = vld [vmem:[%s4741_s9 + $0x20] sm:$0xff]  }
 0x589   :  { %v1335_v10 = vadd.f32 %v4358_v31, %v1312_v7  ;;  %v3784_v7 = vld [vmem:[%s4741_s9 + $0x28] sm:$0xff]  }
 0x58a   :  { %v3644_v26 = vpack.c.bf16 %v1337_v9, %v1336_v8  ;;  %v3777_v8 = vld [vmem:[%s4740_s10 + $0x30] sm:$0xff]  }
 0x58b   :  { %v3640_v12 = vpack.c.bf16 %v1335_v10, %v1334_v35  ;;  %v3396_v14 = vpop.f32.mrb[52].mxu1  ;;  %v3785_v9 = vld [vmem:[%s4741_s9 + $0x30] sm:$0xff]   ;;  %v3778_v35 = vld [vmem:[%s4740_s10 + $0x38] sm:$0xff]  }
 0x58c   :  { %v1317_v15 = vmul.f32 %v3396_v14, %v4096_v48  ;;  %v1264_v36 = vpop.f32.mrb[53].mxu1  ;;  %v3786_v10 = vld [vmem:[%s4741_s9 + $0x38] sm:$0xff]  }
 0x58d   :  { %v1315_v16 = vmul.f32 %v1264_v36, %v4090_v40  ;;  %v3397_v37 = vpop.f32.mrb[54].mxu1  ;;  %3641 = vmatprep.subr.bf16.mxu0 %v3640_v12  ;;  %3673 = vmatprep.subr.bf16.mxu1 %v3640_v12  ;;  %v2399_v36 = vld [vmem:[%s4745_s16 + $0x8] sm:$0xff] }
 0x58e   :  { %v1318_v38 = vmul.f32 %v3397_v37, %v4094_v45  ;;  %v1267_v17 = vpop.f32.mrb[55].mxu1  ;;  %3643 = vmatpush3.bf16.msra.mxu0 %v3640_v12  ;;  %3675 = vmatpush3.bf16.msra.mxu1 %v3640_v12  ;;  %v1340_v51 = vadd.f32 %v4358_v31, %v1317_v15  ;;  %v1737_v12 = vld [vmem:[%s4744_s12 + $0x8] sm:$0xff]  ;;  %v2398_v15 = vld [vmem:[%s4745_s16] sm:$0xff] }
 0x58f   :  { %v1316_v18 = vmul.f32 %v1267_v17, %v4088_v39  ;;  %3645 = vmatprep.subr.bf16.mxu0 %v3644_v26  ;;  %3677 = vmatprep.subr.bf16.mxu1 %v3644_v26  ;;  %v1338_v48 = vadd.f32 %v4358_v31, %v1315_v16  ;;  %v2400_v16 = vld [vmem:[%s4745_s16 + $0x10] sm:$0xff]  ;;  %v3720_v37 = vpack.c.bf16 %v2399_v36, %v2398_v15 }
 0x590   :  { %v1341_v20 = vadd.f32 %v4358_v31, %v1318_v38  ;;  %v2401_v38 = vld [vmem:[%s4745_s16 + $0x18] sm:$0xff] }
 0x591   :  { %v1339_v40 = vadd.f32 %v4358_v31, %v1316_v18  ;;  %v3724_v17 = vpack.c.bf16 %v2401_v38, %v2400_v16  ;;  %v1738_v18 = vld [vmem:[%s4744_s12 + $0x10] sm:$0xff] }
 0x592   :  { %v3652_v21 = vpack.c.bf16 %v1341_v20, %v1340_v51  ;;  %3647 = vmatpush3.bf16.msra.mxu0 %v3644_v26  ;;  %3679 = vmatpush3.bf16.msra.mxu1 %v3644_v26  ;;  %v1736_v26 = vld [vmem:[%s4744_s12] sm:$0xff]  ;;  %v1739_v51 = vld [vmem:[%s4744_s12 + $0x18] sm:$0xff] }
 0x593   :  { %v3648_v23 = vpack.c.bf16 %v1339_v40, %v1338_v48  ;;  %v3400_v45 = vpop.f32.mrb[56].mxu1  ;;  %v3712_v14 = vpack.c.bf16 %v1737_v12, %v1736_v26 }
 0x594   :  { %v1321_v24 = vmul.f32 %v3400_v45, %v4110_v3  ;;  %v1280_v25 = vpop.f32.mrb[57].mxu1  ;;  %v3716_v45 = vpack.c.bf16 %v1739_v51, %v1738_v18 }
 0x595   :  { %v1319_v39 = vmul.f32 %v1280_v25, %v4104_v58  ;;  %v3401_v41 = vpop.f32.mrb[58].mxu1  ;;  %3649 = vmatprep.subr.bf16.mxu0 %v3648_v23  ;;  %3681 = vmatprep.subr.bf16.mxu1 %v3648_v23 }
 0x596   :  { %v1322_v42 = vmul.f32 %v3401_v41, %v4108_v0  ;;  %v1283_v43 = vpop.f32.mrb[59].mxu1  ;;  %3651 = vmatpush3.bf16.msra.mxu0 %v3648_v23  ;;  %3683 = vmatpush3.bf16.msra.mxu1 %v3648_v23  ;;  %v1344_v46 = vadd.f32 %v4358_v31, %v1321_v24  ;;  %v2146_v41 = vld [vmem:[%s4746_s14] sm:$0x1f] }
 0x597   :  { %v1320_v44 = vmul.f32 %v1283_v43, %v4101_v56  ;;  %3653 = vmatprep.subr.bf16.mxu0 %v3652_v21  ;;  %3685 = vmatprep.subr.bf16.mxu1 %v3652_v21  ;;  %v1342_v3 = vadd.f32 %v4358_v31, %v1319_v39 }
 0x598   :  { %v1345_v47 = vadd.f32 %v4358_v31, %v1322_v42 }
 0x599   :  { %v1343_v58 = vadd.f32 %v4358_v31, %v1320_v44 }
 0x59a   :  { %v3660_v49 = vpack.c.bf16 %v1345_v47, %v1344_v46  ;;  %3655 = vmatpush3.bf16.msra.mxu0 %v3652_v21  ;;  %3687 = vmatpush3.bf16.msra.mxu1 %v3652_v21 }
 0x59b   :  { %v3656_v34 = vpack.c.bf16 %v1343_v58, %v1342_v3  ;;  %v3404_v0 = vpop.f32.mrb[60].mxu1 }
 0x59c   :  { %v1325_v50 = vmul.f32 %v3404_v0, %v4124_v22  ;;  %v1296_v52 = vpop.f32.mrb[61].mxu1 }
 0x59d   :  { %v1323_v56 = vmul.f32 %v1296_v52, %v4118_v13  ;;  %v3405_v53 = vpop.f32.mrb[62].mxu1  ;;  %3657 = vmatprep.subr.bf16.mxu0 %v3656_v34  ;;  %3689 = vmatprep.subr.bf16.mxu1 %v3656_v34 }
 0x59e   :  { %v1326_v54 = vmul.f32 %v3405_v53, %v4122_v19  ;;  %v1299_v55 = vpop.f32.mrb[63].mxu1  ;;  %3659 = vmatpush3.bf16.msra.mxu0 %v3656_v34  ;;  %3691 = vmatpush3.bf16.msra.mxu1 %v3656_v34  ;;  %v1348_v59 = vadd.f32 %v4358_v31, %v1325_v50  ;;  %v1740_v19 = vld [vmem:[%s4743_s13] sm:$0xff] }
 0x59f   :  { %v1324_v57 = vmul.f32 %v1299_v55, %v4115_v11  ;;  %3661 = vmatprep.subr.bf16.mxu0 %v3660_v49  ;;  %3693 = vmatprep.subr.bf16.mxu1 %v3660_v49  ;;  %v1346_v22 = vadd.f32 %v4358_v31, %v1323_v56  ;;  %v1741_v11 = vld [vmem:[%s4743_s13 + $0x8] sm:$0xff] }
 0x5a0   :  { %v1349_v60 = vadd.f32 %v4358_v31, %v1326_v54  ;;  %v3704_v63 = vpack.c.bf16 %v1741_v11, %v1740_v19  ;;  %v2130_v11 = vld [vmem:[%s4747_s11] sm:$0xff] }
 0x5a1   :  { %v1347_v13 = vadd.f32 %v4358_v31, %v1324_v57  ;;  %v3774_v31 = vld [vmem:[%s4740_s10 + $0x18] sm:$0xff]  }
 0x5a2   :  { %v3668_v61 = vpack.c.bf16 %v1349_v60, %v1348_v59  ;;  %3663 = vmatpush3.bf16.msra.mxu0 %v3660_v49  ;;  %3695 = vmatpush3.bf16.msra.mxu1 %v3660_v49 }
 0x5a3   :  { %v3664_v62 = vpack.c.bf16 %v1347_v13, %v1346_v22 }
 0x5a5   :  { %3665 = vmatprep.subr.bf16.mxu0 %v3664_v62  ;;  %3697 = vmatprep.subr.bf16.mxu1 %v3664_v62 }
 0x5a6   :  { %3667 = vmatpush3.bf16.msra.mxu0 %v3664_v62  ;;  %3699 = vmatpush3.bf16.msra.mxu1 %v3664_v62 }
 0x5a7   :  { %3669 = vmatprep.subr.bf16.mxu0 %v3668_v61  ;;  %3701 = vmatprep.subr.bf16.mxu1 %v3668_v61 }
 0x5aa   :  { %3671 = vmatpush3.bf16.msra.mxu0 %v3668_v61  ;;  %3703 = vmatpush3.bf16.msra.mxu1 %v3668_v61 }
 0x5ab   :  { %3705 = vmatprep.subr.bf16.mxu0 %v3704_v63  ;;  %3721 = vmatprep.subr.bf16.mxu1 %v3720_v37 }
 0x5ad   :  { %3487 = vmatmul.mubr.bf16.vlgmr.msra.gmra.mrb[64].mxu1 %v3772_v1  ;;  %3439 = vmatmul.mubr.bf16.vlgmr.msra.gmra.mrb[32].mxu0 %v3780_v2  ;;  %v2132_v1 = vld [vmem:[%s4747_s11 + $0x10] sm:$0xff]  ;;  %v2133_v2 = vld [vmem:[%s4747_s11 + $0x18] sm:$0xff] }
 0x5ae   :  { %3490 = vmatprep.mubr.bf16.mxu1 %v3773_v28  ;;  %3442 = vmatprep.mubr.bf16.mxu0 %v3781_v29  ;;  %v2136_v28 = vld [vmem:[%s4747_s11 + $0x30] sm:$0xff]  ;;  %v2137_v29 = vld [vmem:[%s4747_s11 + $0x38] sm:$0xff] }
 0x5af   :  { %3707 = vmatpush3.bf16.msra.mxu0 %v3704_v63  ;;  %3723 = vmatpush3.bf16.msra.mxu1 %v3720_v37  ;;  %v2131_v63 = vld [vmem:[%s4747_s11 + $0x8] sm:$0xff] }
 0x5b0   :  { %3709 = vmatprep.subr.bf16.mxu0 %v3708_v30  ;;  %3725 = vmatprep.subr.bf16.mxu1 %v3724_v17 }
 0x5b3   :  { %3711 = vmatpush3.bf16.msra.mxu0 %v3708_v30  ;;  %3727 = vmatpush3.bf16.msra.mxu1 %v3724_v17  ;;  %v2138_v30 = vld [vmem:[%s4747_s11 + $0x40] sm:$0xff] }
 0x5b4   :  { %3713 = vmatprep.subr.bf16.mxu0 %v3712_v14 }
 0x5b5   :  { %3491 = vmatmul.mubr.bf16.gmra.mrb[68].mxu1 %v3774_v31  ;;  %3443 = vmatmul.mubr.bf16.gmra.mrb[36].mxu0 %v3782_v32  ;;  %v2139_v31 = vld [vmem:[%s4747_s11 + $0x48] sm:$0xff]  ;;  %v2140_v32 = vld [vmem:[%s4747_s11 + $0x50] sm:$0xff] }
 0x5b6   :  { %3494 = vmatprep.mubr.bf16.mxu1 %v3775_v33  ;;  %3446 = vmatprep.mubr.bf16.mxu0 %v3783_v5  ;;  %v2141_v33 = vld [vmem:[%s4747_s11 + $0x58] sm:$0xff]  ;;  %v2142_v5 = vld [vmem:[%s4747_s11 + $0x60] sm:$0xff] }
 0x5bd   :  { %3495 = vmatmul.mubr.bf16.gmra.mrb[72].mxu1 %v3776_v6  ;;  %3447 = vmatmul.mubr.bf16.gmra.mrb[40].mxu0 %v3784_v7  ;;  %v2143_v6 = vld [vmem:[%s4747_s11 + $0x68] sm:$0xff]  ;;  %v2144_v7 = vld [vmem:[%s4747_s11 + $0x70] sm:$0xff] }
 0x5be   :  { %3498 = vmatprep.mubr.bf16.mxu1 %v3777_v8  ;;  %3450 = vmatprep.mubr.bf16.mxu0 %v3785_v9  ;;  %v2145_v8 = vld [vmem:[%s4747_s11 + $0x78] sm:$0xff]  ;;  %v2954_v9 = vld [vmem:[%s4748_s15] ss:$0 sm:$0xff] }
 0x5c5   :  { %3499 = vmatmul.mubr.bf16.gmra.mrb[76].mxu1 %v3778_v35  ;;  %3451 = vmatmul.mubr.bf16.gmra.mrb[44].mxu0 %v3786_v10 }
 0x680   :  { %v3488_v20 = vpop.f32.mrb[64].mxu1  ;;  %v3440_v48 = vpop.f32.mrb[32].mxu0 }
 0x681   :  { %v1673_v40 = vpop.f32.mrb[65].mxu1  ;;  %v1480_v21 = vpop.f32.mrb[33].mxu0 }
 0x682   :  { %v3489_v23 = vpop.f32.mrb[66].mxu1  ;;  %3510 = vmatprep.mubr.msk.f32.mxu0 %vm623_vm2, %v1673_v40  ;;  %v3441_v24 = vpop.f32.mrb[34].mxu0 }
 0x683   :  { %v1676_v25 = vpop.f32.mrb[67].mxu1  ;;  %v1483_v39 = vpop.f32.mrb[35].mxu0 }
 0x684   :  { %3511 = vmatmul.mubr.msk.f32.vlgmr.msra.gmra.mrb[48].mxu0 %vm623_vm2, %v1676_v25 }
 0x685   :  { %3513 = vmatprep.mubr.msk.f32.mxu0 %vm623_vm2, %v3488_v20  ;;  %3715 = vmatpush3.bf16.msra.mxu0 %v3712_v14 }
 0x686   :  { %3717 = vmatprep.subr.bf16.mxu0 %v3716_v45 }
 0x688   :  { %v3492_v42 = vpop.f32.mrb[68].mxu1  ;;  %3514 = vmatmul.mubr.msk.f32.gmra.mrb[50].mxu0 %vm623_vm2, %v3489_v23  ;;  %v3444_v43 = vpop.f32.mrb[36].mxu0 }
 0x689   :  { %v1689_v44 = vpop.f32.mrb[69].mxu1  ;;  %3719 = vmatpush3.bf16.msra.mxu0 %v3716_v45  ;;  %v1496_v46 = vpop.f32.mrb[37].mxu0 }
 0x68a   :  { %v3493_v47 = vpop.f32.mrb[70].mxu1  ;;  %3516 = vmatprep.mubr.msk.f32.mxu0 %vm623_vm2, %v1689_v44  ;;  %3566 = vmatprep.subr.msk.mxu0 %vm166_vm0, %v2146_v41  ;;  %v3445_v3 = vpop.f32.mrb[38].mxu0 }
 0x68b   :  { %v1692_v58 = vpop.f32.mrb[71].mxu1  ;;  %v1499_v49 = vpop.f32.mrb[39].mxu0 }
 0x68c   :  { %3517 = vmatmul.mubr.msk.f32.gmra.mrb[52].mxu0 %vm623_vm2, %v1692_v58 }
 0x68d   :  { %3519 = vmatprep.mubr.msk.f32.mxu0 %vm623_vm2, %v3492_v42 }
 0x690   :  { %v3496_v34 = vpop.f32.mrb[72].mxu1  ;;  %3520 = vmatmul.mubr.msk.f32.gmra.mrb[54].mxu0 %vm623_vm2, %v3493_v47  ;;  %v3448_v0 = vpop.f32.mrb[40].mxu0 }
 0x691   :  { %v1705_v50 = vpop.f32.mrb[73].mxu1  ;;  %v1512_v52 = vpop.f32.mrb[41].mxu0 }
 0x692   :  { %v3497_v56 = vpop.f32.mrb[74].mxu1  ;;  %3522 = vmatprep.mubr.msk.f32.mxu0 %vm623_vm2, %v1705_v50  ;;  %v3449_v53 = vpop.f32.mrb[42].mxu0 }
 0x693   :  { %v1708_v54 = vpop.f32.mrb[75].mxu1  ;;  %v1515_v55 = vpop.f32.mrb[43].mxu0 }
 0x694   :  { %3523 = vmatmul.mubr.msk.f32.gmra.mrb[56].mxu0 %vm623_vm2, %v1708_v54 }
 0x695   :  { %3525 = vmatprep.mubr.msk.f32.mxu0 %vm623_vm2, %v3496_v34 }
 0x698   :  { %v3500_v57 = vpop.f32.mrb[76].mxu1  ;;  %3526 = vmatmul.mubr.msk.f32.gmra.mrb[58].mxu0 %vm623_vm2, %v3497_v56  ;;  %v3452_v59 = vpop.f32.mrb[44].mxu0 }
 0x699   :  { %v1721_v60 = vpop.f32.mrb[77].mxu1  ;;  %v1528_v22 = vpop.f32.mrb[45].mxu0 }
 0x69a   :  { %v3501_v13 = vpop.f32.mrb[78].mxu1  ;;  %3528 = vmatprep.mubr.msk.f32.mxu0 %vm623_vm2, %v1721_v60  ;;  %v3453_v61 = vpop.f32.mrb[46].mxu0 }
 0x69b   :  { %v1724_v62 = vpop.f32.mrb[79].mxu1  ;;  %v1531_v19 = vpop.f32.mrb[47].mxu0 }
 0x69c   :  { %3529 = vmatmul.mubr.msk.f32.gmra.mrb[60].mxu0 %vm623_vm2, %v1724_v62 }
 0x69d   :  { %3531 = vmatprep.mubr.msk.f32.mxu0 %vm623_vm2, %v3500_v57 }
 0x6a0   :  { %3532 = vmatmul.mubr.msk.f32.gmra.mrb[62].mxu0 %vm623_vm2, %v3501_v13 }
 0x6a1   :  { %3542 = vmatprep.mubr.msk.f32.mxu0 %vm623_vm2, %v1480_v21 }
 0x6a4   :  { %3543 = vmatmul.mubr.msk.f32.vlgmr.msra.gmra.mrb[48].mxu0 %vm623_vm2, %v1483_v39 }
 0x6a5   :  { %3545 = vmatprep.mubr.msk.f32.mxu0 %vm623_vm2, %v3440_v48  ;;  %3567 = vmatpush3.msk.msra.mxu0 %vm166_vm0, %v2146_v41 }
 0x6a8   :  { %3546 = vmatmul.mubr.msk.f32.gmra.mrb[50].mxu0 %vm623_vm2, %v3441_v24 }
 0x6a9   :  { %3548 = vmatprep.mubr.msk.f32.mxu0 %vm623_vm2, %v1496_v46 }
 0x6ac   :  { %3549 = vmatmul.mubr.msk.f32.gmra.mrb[52].mxu0 %vm623_vm2, %v1499_v49 }
 0x6ad   :  { %3551 = vmatprep.mubr.msk.f32.mxu0 %vm623_vm2, %v3444_v43 }
 0x6b0   :  { %3552 = vmatmul.mubr.msk.f32.gmra.mrb[54].mxu0 %vm623_vm2, %v3445_v3 }
 0x6b1   :  { %3554 = vmatprep.mubr.msk.f32.mxu0 %vm623_vm2, %v1512_v52 }
 0x6b4   :  { %3555 = vmatmul.mubr.msk.f32.gmra.mrb[56].mxu0 %vm623_vm2, %v1515_v55 }
 0x6b5   :  { %3557 = vmatprep.mubr.msk.f32.mxu0 %vm623_vm2, %v3448_v0 }
 0x6b8   :  { %3558 = vmatmul.mubr.msk.f32.gmra.mrb[58].mxu0 %vm623_vm2, %v3449_v53 }
 0x6b9   :  { %3560 = vmatprep.mubr.msk.f32.mxu0 %vm623_vm2, %v1528_v22 }
 0x6bc   :  { %3561 = vmatmul.mubr.msk.f32.gmra.mrb[60].mxu0 %vm623_vm2, %v1531_v19 }
 0x6bd   :  { %3563 = vmatprep.mubr.msk.f32.mxu0 %vm623_vm2, %v3452_v59 }
 0x6c0   :  { %3564 = vmatmul.mubr.msk.f32.gmra.mrb[62].mxu0 %vm623_vm2, %v3453_v61 }
 0x6c1   :  { %3568 = vmatprep.mubr.msk.f32.mxu0 %vm117_vm1, %v2130_v11 }
 0x6c4   :  { %3569 = vmatmul.mubr.msk.f32.vlgmr.msra.gmra.mrb[48].mxu0 %vm117_vm1, %v2131_v63  ;;  %v25_v63 = vstv %s4749_s19 }
 0x6c5   :  { %3571 = vmatprep.mubr.msk.f32.mxu0 %vm117_vm1, %v2132_v1  ;;  %26 = vst [vmem:[#allocation2] sm:$0x1] %v25_v63  ;;  %v4595_v1 = vld [vmem:[%s4750_s17] ss:$0 sm:$0xff] }
 0x6c8   :  { %3572 = vmatmul.mubr.msk.f32.gmra.mrb[50].mxu0 %vm117_vm1, %v2133_v2 }
 0x6c9   :  { %3574 = vmatprep.mubr.msk.f32.mxu0 %vm117_vm1, %v2134_v4 }
 0x6cc   :  { %3575 = vmatmul.mubr.msk.f32.gmra.mrb[52].mxu0 %vm117_vm1, %v2135_v27 }
 0x6cd   :  { %3577 = vmatprep.mubr.msk.f32.mxu0 %vm117_vm1, %v2136_v28 }
 0x6d0   :  { %3578 = vmatmul.mubr.msk.f32.gmra.mrb[54].mxu0 %vm117_vm1, %v2137_v29  ;;  %v4602_v29 = vld [vmem:[%s4751_s18] ss:$0 sm:$0xff] }
 0x6d1   :  { %3580 = vmatprep.mubr.msk.f32.mxu0 %vm117_vm1, %v2138_v30 }
 0x6d4   :  { %3581 = vmatmul.mubr.msk.f32.gmra.mrb[56].mxu0 %vm117_vm1, %v2139_v31 }
 0x6d5   :  { %3583 = vmatprep.mubr.msk.f32.mxu0 %vm117_vm1, %v2140_v32 }
 0x6d8   :  { %3584 = vmatmul.mubr.msk.f32.gmra.mrb[58].mxu0 %vm117_vm1, %v2141_v33 }
 0x6d9   :  { %3586 = vmatprep.mubr.msk.f32.mxu0 %vm117_vm1, %v2142_v5 }
 0x6dc   :  { %3587 = vmatmul.mubr.msk.f32.gmra.mrb[60].mxu0 %vm117_vm1, %v2143_v6 }
 0x6dd   :  { %3589 = vmatprep.mubr.msk.f32.mxu0 %vm117_vm1, %v2144_v7 }
 0x6e0   :  { %3590 = vmatmul.mubr.msk.f32.gmra.mrb[62].mxu0 %vm117_vm1, %v2145_v8 }
 0x797   :  { %v3570_v35 = vpop.f32.mrb[48].mxu0 }
 0x798   :  { %v2367_v10 = vadd.f32 %v3570_v35, %v2954_v9  ;;  %v2264_v26 = vpop.f32.mrb[49].mxu0 }
 0x799   :  { %v2366_v12 = vadd.f32 %v2954_v9, %v2264_v26 }
 0x79a   :  { %v2383_v36 = vmax.f32 %v2367_v10, 0.0 }
 0x79b   :  { %v2382_v14 = vmax.f32 %v2366_v12, 0.0  ;;  %v3573_v15 = vpop.f32.mrb[50].mxu0 }
 0x79c   :  { %v2369_v16 = vadd.f32 %v3573_v15, %v2954_v9  ;;  %v2274_v37 = vpop.f32.mrb[51].mxu0 }
 0x79d   :  { %v2368_v38 = vadd.f32 %v2954_v9, %v2274_v37  ;;  %3600 = vmatprep.mubr.msk.f32.mxu1 %vm623_vm2, %v2382_v14 }
 0x79e   :  { %3601 = vmatmul.mubr.msk.f32.vlgmr.msra.gmra.mrb[80].mxu1 %vm623_vm2, %v2383_v36  ;;  %v2385_v51 = vmax.f32 %v2369_v16, 0.0 }
 0x79f   :  { %v2384_v17 = vmax.f32 %v2368_v38, 0.0  ;;  %v3576_v18 = vpop.f32.mrb[52].mxu0 }
 0x7a0   :  { %v2371_v20 = vadd.f32 %v3576_v18, %v2954_v9  ;;  %v2284_v48 = vpop.f32.mrb[53].mxu0 }
 0x7a1   :  { %v2370_v40 = vadd.f32 %v2954_v9, %v2284_v48  ;;  %3603 = vmatprep.mubr.msk.f32.mxu1 %vm623_vm2, %v2384_v17 }
 0x7a2   :  { %3604 = vmatmul.mubr.msk.f32.gmra.mrb[82].mxu1 %vm623_vm2, %v2385_v51  ;;  %v2387_v45 = vmax.f32 %v2371_v20, 0.0 }
 0x7a3   :  { %v2386_v21 = vmax.f32 %v2370_v40, 0.0  ;;  %v3579_v23 = vpop.f32.mrb[54].mxu0 }
 0x7a4   :  { %v2373_v24 = vadd.f32 %v3579_v23, %v2954_v9  ;;  %v2294_v25 = vpop.f32.mrb[55].mxu0 }
 0x7a5   :  { %v2372_v39 = vadd.f32 %v2954_v9, %v2294_v25  ;;  %3606 = vmatprep.mubr.msk.f32.mxu1 %vm623_vm2, %v2386_v21 }
 0x7a6   :  { %3607 = vmatmul.mubr.msk.f32.gmra.mrb[84].mxu1 %vm623_vm2, %v2387_v45  ;;  %v2389_v43 = vmax.f32 %v2373_v24, 0.0 }
 0x7a7   :  { %v2388_v41 = vmax.f32 %v2372_v39, 0.0  ;;  %v3582_v42 = vpop.f32.mrb[56].mxu0 }
 0x7a8   :  { %v2375_v44 = vadd.f32 %v3582_v42, %v2954_v9  ;;  %v2304_v46 = vpop.f32.mrb[57].mxu0 }
 0x7a9   :  { %v2374_v47 = vadd.f32 %v2954_v9, %v2304_v46  ;;  %3609 = vmatprep.mubr.msk.f32.mxu1 %vm623_vm2, %v2388_v41 }
 0x7aa   :  { %3610 = vmatmul.mubr.msk.f32.gmra.mrb[86].mxu1 %vm623_vm2, %v2389_v43  ;;  %v2391_v49 = vmax.f32 %v2375_v44, 0.0 }
 0x7ab   :  { %v2390_v3 = vmax.f32 %v2374_v47, 0.0  ;;  %v3585_v58 = vpop.f32.mrb[58].mxu0 }
 0x7ac   :  { %v2377_v34 = vadd.f32 %v3585_v58, %v2954_v9  ;;  %v2314_v0 = vpop.f32.mrb[59].mxu0 }
 0x7ad   :  { %v2376_v50 = vadd.f32 %v2954_v9, %v2314_v0  ;;  %3612 = vmatprep.mubr.msk.f32.mxu1 %vm623_vm2, %v2390_v3 }
 0x7ae   :  { %3613 = vmatmul.mubr.msk.f32.gmra.mrb[88].mxu1 %vm623_vm2, %v2391_v49  ;;  %v2393_v53 = vmax.f32 %v2377_v34, 0.0 }
 0x7af   :  { %v2392_v52 = vmax.f32 %v2376_v50, 0.0  ;;  %v3588_v56 = vpop.f32.mrb[60].mxu0 }
 0x7b0   :  { %v2379_v54 = vadd.f32 %v3588_v56, %v2954_v9  ;;  %v2324_v55 = vpop.f32.mrb[61].mxu0 }
 0x7b1   :  { %v2378_v57 = vadd.f32 %v2954_v9, %v2324_v55  ;;  %3615 = vmatprep.mubr.msk.f32.mxu1 %vm623_vm2, %v2392_v52 }
 0x7b2   :  { %3616 = vmatmul.mubr.msk.f32.gmra.mrb[90].mxu1 %vm623_vm2, %v2393_v53  ;;  %v2395_v22 = vmax.f32 %v2379_v54, 0.0 }
 0x7b3   :  { %v2394_v59 = vmax.f32 %v2378_v57, 0.0  ;;  %v3591_v60 = vpop.f32.mrb[62].mxu0 }
 0x7b4   :  { %v2381_v13 = vadd.f32 %v3591_v60, %v2954_v9  ;;  %v2334_v61 = vpop.f32.mrb[63].mxu0 }
 0x7b5   :  { %v2380_v62 = vadd.f32 %v2954_v9, %v2334_v61  ;;  %3618 = vmatprep.mubr.msk.f32.mxu1 %vm623_vm2, %v2394_v59 }
 0x7b6   :  { %3619 = vmatmul.mubr.msk.f32.gmra.mrb[92].mxu1 %vm623_vm2, %v2395_v22  ;;  %v2397_v11 = vmax.f32 %v2381_v13, 0.0 }
 0x7b7   :  { %v2396_v19 = vmax.f32 %v2380_v62, 0.0 }
 0x7b9   :  { %3621 = vmatprep.mubr.msk.f32.mxu1 %vm623_vm2, %v2396_v19 }
 0x7ba   :  { %3622 = vmatmul.mubr.msk.f32.gmra.mrb[94].mxu1 %vm623_vm2, %v2397_v11 }
 0x871   :  { %v3602_v2 = vpop.f32.mrb[80].mxu1 }
 0x872   :  { %v2529_v4 = vadd.f32 %v3602_v2, %v4595_v1  ;;  %v2523_v27 = vpop.f32.mrb[81].mxu1 }
 0x873   :  { %v2524_v28 = vadd.f32 %v4595_v1, %v2523_v27 }
 0x874   :  { %v2603_v30 = vmax.f32 %v2529_v4, 0.0 }
 0x875   :  { %v2602_v31 = vmax.f32 %v2524_v28, 0.0  ;;  %v3605_v32 = vpop.f32.mrb[82].mxu1 }
 0x876   :  { %v2539_v33 = vadd.f32 %v3605_v32, %v4595_v1  ;;  %v2533_v5 = vpop.f32.mrb[83].mxu1  ;;  %v2626_v6 = vmul.f32 %v4602_v29, %v2603_v30 }
 0x877   :  { %v2534_v7 = vadd.f32 %v4595_v1, %v2533_v5  ;;  %v2625_v8 = vmul.f32 %v4602_v29, %v2602_v31 }
 0x878   :  { %v2605_v9 = vmax.f32 %v2539_v33, 0.0  ;;  %v2644_v35 = vsel %vm623_vm2, %v2626_v6, 0.0 }
 0x879   :  { %v2604_v10 = vmax.f32 %v2534_v7, 0.0  ;;  %2645 = vadd.xlane.f32.xlu1 %v2644_v35  ;;  %v3608_v26 = vpop.f32.mrb[84].mxu1  ;;  %v2641_v12 = vsel %vm623_vm2, %v2625_v8, 0.0 }
 0x87a   :  { %v2549_v14 = vadd.f32 %v3608_v26, %v4595_v1  ;;  %2642 = vadd.xlane.f32.xlu0 %v2641_v12  ;;  %v2543_v15 = vpop.f32.mrb[85].mxu1  ;;  %v2628_v36 = vmul.f32 %v4602_v29, %v2605_v9 }
 0x87b   :  { %v2544_v16 = vadd.f32 %v4595_v1, %v2543_v15  ;;  %v2627_v51 = vmul.f32 %v4602_v29, %v2604_v10 }
 0x87c   :  { %v2607_v37 = vmax.f32 %v2549_v14, 0.0  ;;  %v2650_v38 = vsel %vm623_vm2, %v2628_v36, 0.0  ;;  %v4650_v14 = vld [vmem:[#allocation2] ss:$0 sm:$0xff] }
 0x87d   :  { %v2606_v17 = vmax.f32 %v2544_v16, 0.0  ;;  %v3611_v18 = vpop.f32.mrb[86].mxu1  ;;  %v2647_v39 = vsel %vm623_vm2, %v2627_v51, 0.0 }
 0x87e   :  { %v2559_v20 = vadd.f32 %v3611_v18, %v4595_v1  ;;  %2651 = vadd.xlane.f32.xlu0 %v2650_v38  ;;  %v2553_v48 = vpop.f32.mrb[87].mxu1  ;;  %v2630_v23 = vmul.f32 %v4602_v29, %v2607_v37 }
 0x87f   :  { %v2554_v40 = vadd.f32 %v4595_v1, %v2553_v48  ;;  %v2629_v21 = vmul.f32 %v4602_v29, %v2606_v17 }
 0x880   :  { %v2609_v45 = vmax.f32 %v2559_v20, 0.0  ;;  %v2656_v47 = vsel %vm623_vm2, %v2630_v23, 0.0 }
 0x881   :  { %v2608_v24 = vmax.f32 %v2554_v40, 0.0  ;;  %v3614_v25 = vpop.f32.mrb[88].mxu1  ;;  %v2653_v41 = vsel %vm623_vm2, %v2629_v21, 0.0 }
 0x882   :  { %v2569_v42 = vadd.f32 %v3614_v25, %v4595_v1  ;;  %2648 = vadd.xlane.f32.xlu0 %v2647_v39  ;;  %2654 = vadd.xlane.f32.xlu1 %v2653_v41  ;;  %v2563_v43 = vpop.f32.mrb[89].mxu1  ;;  %v2632_v0 = vmul.f32 %v4602_v29, %v2609_v45 }
 0x883   :  { %v2564_v44 = vadd.f32 %v4595_v1, %v2563_v43  ;;  %v2631_v46 = vmul.f32 %v4602_v29, %v2608_v24 }
 0x884   :  { %v2611_v3 = vmax.f32 %v2569_v42, 0.0  ;;  %v2662_v59 = vsel %vm623_vm2, %v2632_v0, 0.0 }
 0x885   :  { %v2610_v58 = vmax.f32 %v2564_v44, 0.0  ;;  %v3617_v49 = vpop.f32.mrb[90].mxu1  ;;  %v2659_v34 = vsel %vm623_vm2, %v2631_v46, 0.0 }
 0x886   :  { %v2579_v50 = vadd.f32 %v3617_v49, %v4595_v1  ;;  %2657 = vadd.xlane.f32.xlu0 %v2656_v47  ;;  %2660 = vadd.xlane.f32.xlu1 %v2659_v34  ;;  %v2573_v52 = vpop.f32.mrb[91].mxu1  ;;  %v2634_v22 = vmul.f32 %v4602_v29, %v2611_v3 }
 0x887   :  { %v2574_v56 = vadd.f32 %v4595_v1, %v2573_v52  ;;  %v2633_v53 = vmul.f32 %v4602_v29, %v2610_v58 }
 0x888   :  { %v2613_v54 = vmax.f32 %v2579_v50, 0.0  ;;  %v2668_v27 = vsel %vm623_vm2, %v2634_v22, 0.0 }
 0x889   :  { %v2612_v55 = vmax.f32 %v2574_v56, 0.0  ;;  %v3620_v57 = vpop.f32.mrb[92].mxu1  ;;  %v2665_v60 = vsel %vm623_vm2, %v2633_v53, 0.0 }
 0x88a   :  { %v2589_v13 = vadd.f32 %v3620_v57, %v4595_v1  ;;  %2663 = vadd.xlane.f32.xlu0 %v2662_v59  ;;  %2666 = vadd.xlane.f32.xlu1 %v2665_v60  ;;  %v2583_v61 = vpop.f32.mrb[93].mxu1  ;;  %v2636_v11 = vmul.f32 %v4602_v29, %v2613_v54 }
 0x88b   :  { %v2584_v62 = vadd.f32 %v4595_v1, %v2583_v61  ;;  %v2635_v19 = vmul.f32 %v4602_v29, %v2612_v55 }
 0x88c   :  { %v2615_v63 = vmax.f32 %v2589_v13, 0.0  ;;  %v2674_v5 = vsel %vm623_vm2, %v2636_v11, 0.0 }
 0x88d   :  { %v2614_v2 = vmax.f32 %v2584_v62, 0.0  ;;  %v3623_v4 = vpop.f32.mrb[94].mxu1  ;;  %v2671_v28 = vsel %vm623_vm2, %v2635_v19, 0.0 }
 0x88e   :  { %v2599_v30 = vadd.f32 %v3623_v4, %v4595_v1  ;;  %2669 = vadd.xlane.f32.xlu0 %v2668_v27  ;;  %2672 = vadd.xlane.f32.xlu1 %v2671_v28  ;;  %v2593_v31 = vpop.f32.mrb[95].mxu1  ;;  %v2638_v9 = vmul.f32 %v4602_v29, %v2615_v63 }
 0x88f   :  { %v2594_v32 = vadd.f32 %v4595_v1, %v2593_v31  ;;  %v2637_v33 = vmul.f32 %v4602_v29, %v2614_v2 }
 0x890   :  { %v2617_v6 = vmax.f32 %v2599_v30, 0.0  ;;  %v2680_v10 = vsel %vm623_vm2, %v2638_v9, 0.0 }
 0x891   :  { %v2616_v7 = vmax.f32 %v2594_v32, 0.0  ;;  %v2677_v8 = vsel %vm623_vm2, %v2637_v33, 0.0 }
 0x892   :  { %2675 = vadd.xlane.f32.xlu0 %v2674_v5  ;;  %2678 = vadd.xlane.f32.xlu1 %v2677_v8  ;;  %v2640_v1 = vmul.f32 %v4602_v29, %v2617_v6 }
 0x893   :  { %v2639_v35 = vmul.f32 %v4602_v29, %v2616_v7 }
 0x894   :  { %v2686_v12 = vsel %vm623_vm2, %v2640_v1, 0.0 }
 0x895   :  { %v2683_v26 = vsel %vm623_vm2, %v2639_v35, 0.0 }
 0x896   :  { %2681 = vadd.xlane.f32.xlu0 %v2680_v10  ;;  %2684 = vadd.xlane.f32.xlu1 %v2683_v26 }
 0x89a   :  { %2687 = vadd.xlane.f32.xlu0 %v2686_v12 }
 0x906   :  { %v2646_v15 = vpop.xlane.xlu1 %2645 }
 0x907   :  { %v2697_v36 = vadd.f32 %v4650_v14, %v2646_v15  ;;  %v2643_v16 = vpop.xlane.xlu0 %2642 }
 0x908   :  { %v2696_v37 = vadd.f32 %v4650_v14, %v2643_v16 }
 0x909   :  { %v2975_v38 = vmul.f32 -1.442695, %v2697_v36 }
 0x90a   :  { %v2974_v17 = vmul.f32 -1.442695, %v2696_v37 }
 0x90b   :  { %3787 = vpow2.f32 %v2975_v38  ;;  %v2652_v18 = vpop.xlane.xlu0 %2651 }
 0x90c   :  { %3789 = vpow2.f32 %v2974_v17  ;;  %v2699_v29 = vadd.f32 %v4650_v14, %v2652_v18 }
 0x90e   :  { %v2977_v51 = vmul.f32 -1.442695, %v2699_v29 }
 0x90f   :  { %v2649_v20 = vpop.xlane.xlu0 %2648  ;;  %v2655_v48 = vpop.xlane.xlu1 %2654 }
 0x910   :  { %3791 = vpow2.f32 %v2977_v51  ;;  %v2698_v40 = vadd.f32 %v4650_v14, %v2649_v20  ;;  %v2700_v21 = vadd.f32 %v4650_v14, %v2655_v48 }
 0x912   :  { %v2976_v23 = vmul.f32 -1.442695, %v2698_v40  ;;  %v2978_v45 = vmul.f32 -1.442695, %v2700_v21 }
 0x913   :  { %v2658_v24 = vpop.xlane.xlu0 %2657  ;;  %v2661_v25 = vpop.xlane.xlu1 %2660 }
 0x914   :  { %3793 = vpow2.f32 %v2976_v23  ;;  %v2701_v39 = vadd.f32 %v4650_v14, %v2658_v24  ;;  %v2702_v41 = vadd.f32 %v4650_v14, %v2661_v25 }
 0x915   :  { %v3788_v42 = vpop.eup %3787  ;;  %3795 = vpow2.f32 %v2978_v45 }
 0x916   :  { %v3790_v43 = vpop.eup %3789  ;;  %v2761_v44 = vadd.f32 1.0, %v3788_v42  ;;  %v2979_v46 = vmul.f32 -1.442695, %v2701_v39  ;;  %v2980_v3 = vmul.f32 -1.442695, %v2702_v41 }
 0x917   :  { %v2760_v47 = vadd.f32 1.0, %v3790_v43  ;;  %v2664_v58 = vpop.xlane.xlu0 %2663  ;;  %v2667_v49 = vpop.xlane.xlu1 %2666 }
 0x918   :  { %3797 = vrcp.f32 %v2761_v44  ;;  %v2703_v34 = vadd.f32 %v4650_v14, %v2664_v58  ;;  %v2704_v0 = vadd.f32 %v4650_v14, %v2667_v49 }
 0x919   :  { %3799 = vrcp.f32 %v2760_v47 }
 0x91a   :  { %v3792_v50 = vpop.eup %3791  ;;  %3801 = vpow2.f32 %v2979_v46  ;;  %v2981_v52 = vmul.f32 -1.442695, %v2703_v34  ;;  %v2982_v56 = vmul.f32 -1.442695, %v2704_v0 }
 0x91b   :  { %v2763_v53 = vadd.f32 1.0, %v3792_v50  ;;  %3803 = vpow2.f32 %v2980_v3  ;;  %v2670_v54 = vpop.xlane.xlu0 %2669  ;;  %v2673_v55 = vpop.xlane.xlu1 %2672 }
 0x91c   :  { %3805 = vpow2.f32 %v2981_v52  ;;  %v2705_v57 = vadd.f32 %v4650_v14, %v2670_v54  ;;  %v2706_v59 = vadd.f32 %v4650_v14, %v2673_v55 }
 0x91d   :  { %3807 = vrcp.f32 %v2763_v53 }
 0x91e   :  { %v3794_v60 = vpop.eup %3793  ;;  %3809 = vpow2.f32 %v2982_v56  ;;  %v2983_v22 = vmul.f32 -1.442695, %v2705_v57  ;;  %v2984_v62 = vmul.f32 -1.442695, %v2706_v59 }
 0x91f   :  { %v3796_v13 = vpop.eup %3795  ;;  %v2762_v61 = vadd.f32 1.0, %v3794_v60  ;;  %v2676_v19 = vpop.xlane.xlu0 %2675 }
 0x920   :  { %v2679_v11 = vpop.xlane.xlu1 %2678  ;;  %v2764_v63 = vadd.f32 1.0, %v3796_v13  ;;  %3811 = vpow2.f32 %v2983_v22  ;;  %v2707_v2 = vadd.f32 %v4650_v14, %v2676_v19 }
 0x921   :  { %v2708_v4 = vadd.f32 %v4650_v14, %v2679_v11  ;;  %3813 = vrcp.f32 %v2762_v61 }
 0x922   :  { %v3798_v27 = vpop.eup %3797  ;;  %3815 = vrcp.f32 %v2764_v63  ;;  %v2985_v28 = vmul.f32 -1.442695, %v2707_v2 }
 0x923   :  { %v2986_v30 = vmul.f32 -1.442695, %v2708_v4  ;;  %v3800_v31 = vpop.eup %3799  ;;  %2810 = vst.msk [vmem:[%s4752_s20 + $0x8] sm:$0xff] %vm2808_vm3, %v3798_v27  ;;  %3817 = vpow2.f32 %v2984_v62  ;;  %v2682_v32 = vpop.xlane.xlu0 %2681 }
 0x924   :  { %v2685_v33 = vpop.xlane.xlu1 %2684  ;;  %v3802_v5 = vpop.eup %3801  ;;  %2809 = vst.msk [vmem:[%s4752_s20] sm:$0xff] %vm2808_vm3, %v3800_v31  ;;  %3819 = vpow2.f32 %v2985_v28  ;;  %v2709_v6 = vadd.f32 %v4650_v14, %v2682_v32 }
 0x925   :  { %v2710_v7 = vadd.f32 %v4650_v14, %v2685_v33  ;;  %v3804_v8 = vpop.eup %3803  ;;  %v2765_v9 = vadd.f32 1.0, %v3802_v5  ;;  %3821 = vpow2.f32 %v2986_v30 }
 0x926   :  { %v3806_v35 = vpop.eup %3805  ;;  %v2766_v10 = vadd.f32 1.0, %v3804_v8  ;;  %v2987_v26 = vmul.f32 -1.442695, %v2709_v6 }
 0x927   :  { %v3808_v1 = vpop.eup %3807  ;;  %3823 = vrcp.f32 %v2765_v9  ;;  %v2767_v12 = vadd.f32 1.0, %v3806_v35  ;;  %v2688_v15 = vpop.xlane.xlu0 %2687  ;;  %v2988_v16 = vmul.f32 -1.442695, %v2710_v7 }
 0x928   :  { %v3810_v36 = vpop.eup %3809  ;;  %2812 = vst.msk [vmem:[%s4752_s20 + $0x18] sm:$0xff] %vm2808_vm3, %v3808_v1  ;;  %3825 = vrcp.f32 %v2766_v10  ;;  %v2711_v37 = vadd.f32 %v4650_v14, %v2688_v15 }
 0x929   :  { %3827 = vrcp.f32 %v2767_v12  ;;  %v2768_v38 = vadd.f32 1.0, %v3810_v36 }
 0x92a   :  { %v3812_v17 = vpop.eup %3811  ;;  %3829 = vpow2.f32 %v2987_v26  ;;  %v2989_v18 = vmul.f32 -1.442695, %v2711_v37 }
 0x92b   :  { %v3814_v29 = vpop.eup %3813  ;;  %3831 = vrcp.f32 %v2768_v38  ;;  %v2769_v51 = vadd.f32 1.0, %v3812_v17 }
 0x92c   :  { %v3816_v20 = vpop.eup %3815  ;;  %2811 = vst.msk [vmem:[%s4752_s20 + $0x10] sm:$0xff] %vm2808_vm3, %v3814_v29  ;;  %3833 = vpow2.f32 %v2988_v16 }
 0x92d   :  { %v3818_v48 = vpop.eup %3817  ;;  %2813 = vst.msk [vmem:[%s4752_s20 + $0x20] sm:$0xff] %vm2808_vm3, %v3816_v20  ;;  %3835 = vrcp.f32 %v2769_v51 }
 0x92e   :  { %v3820_v14 = vpop.eup %3819  ;;  %v2770_v40 = vadd.f32 1.0, %v3818_v48  ;;  %3837 = vpow2.f32 %v2989_v18 }
 0x92f   :  { %v3822_v21 = vpop.eup %3821  ;;  %v2771_v23 = vadd.f32 1.0, %v3820_v14 }
 0x930   :  { %3839 = vrcp.f32 %v2770_v40  ;;  %v2772_v45 = vadd.f32 1.0, %v3822_v21 }
 0x931   :  { %v3824_v24 = vpop.eup %3823  ;;  %3841 = vrcp.f32 %v2771_v23 }
 0x932   :  { %v3826_v25 = vpop.eup %3825  ;;  %2814 = vst.msk [vmem:[%s4752_s20 + $0x28] sm:$0xff] %vm2808_vm3, %v3824_v24  ;;  %3843 = vrcp.f32 %v2772_v45 }
 0x933   :  { %v3828_v39 = vpop.eup %3827  ;;  %2815 = vst.msk [vmem:[%s4752_s20 + $0x30] sm:$0xff] %vm2808_vm3, %v3826_v25 }
 0x934   :  { %v3830_v41 = vpop.eup %3829  ;;  %2816 = vst.msk [vmem:[%s4752_s20 + $0x38] sm:$0xff] %vm2808_vm3, %v3828_v39 }
 0x935   :  { %v3832_v42 = vpop.eup %3831  ;;  %v2773_v43 = vadd.f32 1.0, %v3830_v41 }
 0x936   :  { %v3834_v44 = vpop.eup %3833  ;;  %2817 = vst.msk [vmem:[%s4752_s20 + $0x40] sm:$0xff] %vm2808_vm3, %v3832_v42 }
 0x937   :  { %v3836_v46 = vpop.eup %3835  ;;  %3845 = vrcp.f32 %v2773_v43  ;;  %v2774_v47 = vadd.f32 1.0, %v3834_v44 }
 0x938   :  { %v3838_v3 = vpop.eup %3837  ;;  %2818 = vst.msk [vmem:[%s4752_s20 + $0x48] sm:$0xff] %vm2808_vm3, %v3836_v46 }
 0x939   :  { %3847 = vrcp.f32 %v2774_v47  ;;  %v2775_v58 = vadd.f32 1.0, %v3838_v3 }
 0x93a   :  { %v3840_v49 = vpop.eup %3839 }
 0x93b   :  { %v3842_v34 = vpop.eup %3841  ;;  %2819 = vst.msk [vmem:[%s4752_s20 + $0x50] sm:$0xff] %vm2808_vm3, %v3840_v49  ;;  %3849 = vrcp.f32 %v2775_v58 }
 0x93c   :  { %v3844_v0 = vpop.eup %3843  ;;  %2820 = vst.msk [vmem:[%s4752_s20 + $0x58] sm:$0xff] %vm2808_vm3, %v3842_v34 }
 0x93d   :  { %2821 = vst.msk [vmem:[%s4752_s20 + $0x60] sm:$0xff] %vm2808_vm3, %v3844_v0 }
 0x941   :  { %v3846_v50 = vpop.eup %3845 }
 0x942   :  { %2822 = vst.msk [vmem:[%s4752_s20 + $0x68] sm:$0xff] %vm2808_vm3, %v3846_v50 }
 0x943   :  { %v3848_v52 = vpop.eup %3847 }
 0x944   :  { %2823 = vst.msk [vmem:[%s4752_s20 + $0x70] sm:$0xff] %vm2808_vm3, %v3848_v52 }
 0x945   :  { %v3850_v56 = vpop.eup %3849 }
 0x946   :  { %2824 = vst.msk [vmem:[%s4752_s20 + $0x78] sm:$0xff] %vm2808_vm3, %v3850_v56 }

</bundles_post_ra>
